<compile_context>
chip_gen: v7x
topology: tpu7x:2x2x1
jax: 0.10.0
libtpu: 0.0.40
codegen_flags: <defaults>
</compile_context>

<pallas_src>
import functools

import jax
import jax.numpy as jnp
from jax.experimental import pallas as pl
from jax.experimental.pallas import tpu as pltpu


_LANE = 128     # lane width: pad feature (last) dims to a multiple of this
_SUBLANE = 8    # f32 sublane width (bf16 uses 16)


def _round_up(n: int, m: int) -> int:
    return ((n + m - 1) // m) * m


def _pad2(a, rows: int, cols: int):
    return jnp.pad(a, ((0, rows - a.shape[0]), (0, cols - a.shape[1])))


# ----------------------------------------------------------------------------
# Fused Pallas kernel: encoder -> decoder -> soft_assign for one batch tile
# ----------------------------------------------------------------------------
def _idec_fused_kernel(
    x_ref,
    w1_ref, b1_ref, w2_ref, b2_ref, w3_ref, b3_ref,        # encoder
    w4_ref, b4_ref, w5_ref, b5_ref, w6_ref, b6_ref,        # decoder
    mu_t_ref, mu2_ref, cmask_ref,                          # soft-assign consts
    z_ref, q_ref, xh_ref,                                  # outputs
    *, alpha: float, matmul_dtype,
):
    md = matmul_dtype

    def lin(h, w_ref, b_ref, relu):
        # low-precision operands, f32 accumulation on the MXU
        y = jnp.dot(h, w_ref[...], preferred_element_type=jnp.float32)
        y = y + b_ref[...]                    # bias is (1, nout) f32, broadcasts
        return jnp.maximum(y, 0.0) if relu else y

    x = x_ref[...]                            # already matmul_dtype
    # encoder: Linear-ReLU-Linear-ReLU-Linear
    h = lin(x, w1_ref, b1_ref, True).astype(md)
    h = lin(h, w2_ref, b2_ref, True).astype(md)
    z = lin(h, w3_ref, b3_ref, False)         # f32 latent
    z_lo = z.astype(md)
    # decoder: Linear-ReLU-Linear-ReLU-Linear
    g = lin(z_lo, w4_ref, b4_ref, True).astype(md)
    g = lin(g, w5_ref, b5_ref, True).astype(md)
    xh = lin(g, w6_ref, b6_ref, False)        # f32 reconstruction

    z_ref[...] = z.astype(z_ref.dtype)
    xh_ref[...] = xh.astype(xh_ref.dtype)

    # student-t soft assignment (f32 epilogue); squared distance via MXU:
    #   ||z - mu||^2 = ||z||^2 + ||mu||^2 - 2 * z @ mu^T
    # mu^T and ||mu||^2 are precomputed constants passed from the wrapper.
    z2 = jnp.sum(z * z, axis=1, keepdims=True)                          # (TB,1)
    cross = jnp.dot(z_lo, mu_t_ref[...],
                    preferred_element_type=jnp.float32)                 # (TB,Cp)
    dist = jnp.maximum(z2 + mu2_ref[...] - 2.0 * cross, 0.0)

    if alpha == 1.0:
        q = pl.reciprocal(1.0 + dist, approx=True)
        q = q * q                             # q ** (alpha + 1.0) with alpha == 1
    else:
        q = pl.reciprocal(1.0 + dist * (1.0 / alpha), approx=True)
        q = q ** (alpha + 1.0)
    # the /2.0 of the torch source cancels in the row normalization below.
    q = q * cmask_ref[...]                    # zero padded cluster columns
    q = q * pl.reciprocal(jnp.sum(q, axis=1, keepdims=True), approx=True)
    q_ref[...] = q.astype(q_ref.dtype)


# ----------------------------------------------------------------------------
# One-time parameter preparation: pad to lane-dense shapes, cast, precompute
# the mu-side constants.  Call this OUTSIDE the step, not on every forward.
# ----------------------------------------------------------------------------
def prepare_params(params, *, matmul_dtype=jnp.bfloat16):
    w1, b1 = params["enc1"]
    w2, b2 = params["enc2"]
    w3, b3 = params["enc3"]
    w4, b4 = params["dec1"]
    w5, b5 = params["dec2"]
    w6, b6 = params["dec3"]
    mu = params["mu"]

    nin, nh = w1.shape
    nz = w3.shape[1]
    nc = mu.shape[0]
    nin_p, nh_p, nz_p, nc_p = (_round_up(d, _LANE) for d in (nin, nh, nz, nc))

    md, f32 = matmul_dtype, jnp.float32

    def wpad(w, r, c):
        return _pad2(w.astype(f32), r, c).astype(md)

    def bpad(b, c):
        return _pad2(b.astype(f32).reshape(1, -1), 1, c)

    mu_f32 = mu.astype(f32)
    padded = dict(
        w1=wpad(w1, nin_p, nh_p), b1=bpad(b1, nh_p),
        w2=wpad(w2, nh_p, nh_p),  b2=bpad(b2, nh_p),
        w3=wpad(w3, nh_p, nz_p),  b3=bpad(b3, nz_p),
        w4=wpad(w4, nz_p, nh_p),  b4=bpad(b4, nh_p),
        w5=wpad(w5, nh_p, nh_p),  b5=bpad(b5, nh_p),
        w6=wpad(w6, nh_p, nin_p), b6=bpad(b6, nin_p),
        mu_t=_pad2(mu_f32.T, nz_p, nc_p).astype(md),                 # (nz_p,nc_p)
        mu2=_pad2(jnp.sum(mu_f32 * mu_f32, axis=1).reshape(1, -1), 1, nc_p),
        cmask=(jnp.arange(nc_p) < nc).astype(f32).reshape(1, nc_p),
    )
    dims = dict(nin=nin, nh=nh, nz=nz, nc=nc,
                nin_p=nin_p, nh_p=nh_p, nz_p=nz_p, nc_p=nc_p,
                matmul_dtype=md)
    return padded, dims


# ----------------------------------------------------------------------------
# Wrapper: pads x, builds the batch-tiled grid, slices results back
# ----------------------------------------------------------------------------
def idec_forward(padded_params, dims, x, *, alpha: float = 1.0,
                 batch_tile: int = 256):
    """Mirrors IDEC.forward: z = encoder(x); x_hat = decoder(z); q = soft_assign(z)."""
    B = x.shape[0]
    nin, nz, nc = dims["nin"], dims["nz"], dims["nc"]
    nin_p, nh_p = dims["nin_p"], dims["nh_p"]
    nz_p, nc_p = dims["nz_p"], dims["nc_p"]
    md = dims["matmul_dtype"]
    f32 = jnp.float32

    # Batch tile: multiple of the sublane granularity for the matmul dtype
    # (16 for bf16, 8 for f32).  Prefer >= 2 grid steps when the batch allows
    # so the "parallel" axis can shard across v7x's two TensorCores.
    sub = 16 if jnp.dtype(md).itemsize == 2 else _SUBLANE
    tb_cap = _round_up(B, sub)
    if B >= 2 * sub:
        tb_cap = _round_up(-(-B // 2), sub)
    tb = max(sub, min(_round_up(batch_tile, sub), tb_cap))
    b_p = _round_up(B, tb)
    grid = (b_p // tb,)

    xp = _pad2(x.astype(md), b_p, nin_p)

    p = padded_params
    const_ops = (p["w1"], p["b1"], p["w2"], p["b2"], p["w3"], p["b3"],
                 p["w4"], p["b4"], p["w5"], p["b5"], p["w6"], p["b6"],
                 p["mu_t"], p["mu2"], p["cmask"])

    batch_map = lambda i: (i, 0)     # noqa: E731  (batch-tiled arrays)
    const_map = lambda i: (0, 0)     # noqa: E731  (VMEM-resident constants)

    out_specs = [
        pl.BlockSpec((tb, nz_p), batch_map),
        pl.BlockSpec((tb, nc_p), batch_map),
        pl.BlockSpec((tb, nin_p), batch_map),
    ]
    out_shape = (
        jax.ShapeDtypeStruct((b_p, nz_p), f32),
        jax.ShapeDtypeStruct((b_p, nc_p), f32),
        jax.ShapeDtypeStruct((b_p, nin_p), f32),
    )

    # explicit VMEM budget: resident constants (worst case double-buffered)
    # + pipelined I/O tiles + activation temporaries + headroom, clamped so it
    # stays within v7x's 64 MiB physical VMEM.
    const_bytes = sum(int(a.size) * a.dtype.itemsize for a in const_ops)
    io_tile_bytes = (tb * nin_p * jnp.dtype(md).itemsize
                     + 4 * tb * (nz_p + nc_p + nin_p))
    vmem_limit = int(min(max(2 * const_bytes + 4 * io_tile_bytes
                             + 4 * tb * nh_p + (8 << 20), 32 << 20), 64 << 20))

    mm_flops = 2 * b_p * (nin_p * nh_p + nh_p * nh_p + nh_p * nz_p
                          + nz_p * nh_p + nh_p * nh_p + nh_p * nin_p
                          + nz_p * nc_p)
    cost = pl.CostEstimate(
        flops=int(mm_flops),
        transcendentals=int(2 * b_p * nc_p),          # two EUP reciprocals
        bytes_accessed=int(const_bytes
                           + int(xp.size) * xp.dtype.itemsize
                           + 4 * b_p * (nz_p + nc_p + nin_p)),
    )

    kernel = functools.partial(_idec_fused_kernel, alpha=alpha, matmul_dtype=md)

    def call(const_pipeline_mode):
        kw = {} if const_pipeline_mode is None else {
            "pipeline_mode": const_pipeline_mode}
        in_specs = [pl.BlockSpec((tb, nin_p), batch_map)] + [
            pl.BlockSpec(tuple(a.shape), const_map, **kw) for a in const_ops]
        return pl.pallas_call(
            kernel,
            out_shape=out_shape,
            grid=grid,
            in_specs=in_specs,
            out_specs=out_specs,
            compiler_params=pltpu.CompilerParams(
                dimension_semantics=("parallel",),
                vmem_limit_bytes=vmem_limit),
            cost_estimate=cost,
        )(xp, *const_ops)

    try:
        # grid-invariant operands: one pipeline buffer is enough (halves the
        # resident-weight VMEM footprint vs the default double buffering).
        z_p, q_p, xh_p = call(pl.Buffered(1))
    except Exception:
        # fallback if this jax build rejects pipeline_mode=pl.Buffered(1)
        z_p, q_p, xh_p = call(None)

    # strip batch / feature padding
    return z_p[:B, :nz], q_p[:B, :nc], xh_p[:B, :nin]

# NOTE: for very wide hidden layers (nh ~ 2048 at f32) the all-resident-weight
# design can exceed v7x's 64 MiB VMEM even in bf16; a K-tiled accumulator
# variant (grid axis over nh marked "arbitrary") would be the next step there.


# ----------------------------------------------------------------------------
# Parameter init (mimics torch.nn.Linear default uniform +-1/sqrt(fan_in))
# ----------------------------------------------------------------------------
def _init_linear(key, fan_in, fan_out):
    kw, kb = jax.random.split(key)
    bound = 1.0 / jnp.sqrt(jnp.float32(fan_in))
    w = jax.random.uniform(kw, (fan_in, fan_out), jnp.float32, -bound, bound)
    b = jax.random.uniform(kb, (fan_out,), jnp.float32, -bound, bound)
    return w, b


def init_idec_params(key, nin, nh, nz, nclusters):
    keys = jax.random.split(key, 7)
    return {
        # encoder Net(nin, nh, nz)
        "enc1": _init_linear(keys[0], nin, nh),
        "enc2": _init_linear(keys[1], nh, nh),
        "enc3": _init_linear(keys[2], nh, nz),
        # decoder Net(nz, nh, nin)
        "dec1": _init_linear(keys[3], nz, nh),
        "dec2": _init_linear(keys[4], nh, nh),
        "dec3": _init_linear(keys[5], nh, nin),
        # cluster centroids (torch leaves them uninitialized; we use a normal draw)
        "mu": jax.random.normal(keys[6], (nclusters, nz), jnp.float32),
    }


# ----------------------------------------------------------------------------
# Pure-JAX f32 reference (matches the PyTorch forward exactly)
# ----------------------------------------------------------------------------
def idec_forward_ref(params, x, *, alpha: float = 1.0):
    def lin(h, w, b, relu):
        y = h @ w + b
        return jnp.maximum(y, 0.0) if relu else y

    h = lin(x, *params["enc1"], True)
    h = lin(h, *params["enc2"], True)
    z = lin(h, *params["enc3"], False)
    g = lin(z, *params["dec1"], True)
    g = lin(g, *params["dec2"], True)
    x_hat = lin(g, *params["dec3"], False)
    mu = params["mu"]
    dist = jnp.sum((z[:, None, :] - mu[None, :, :]) ** 2, axis=2)
    q = 1.0 / (1.0 + dist / alpha)
    q = q ** (alpha + 1.0) / 2.0            # matches torch source precedence
    q = q / jnp.sum(q, axis=1, keepdims=True)
    return z, q, x_hat


if __name__ == "__main__":
    # Small shapes consistent with the module: flattened images of 64 pixels,
    # hidden 32, latent 16, 8 clusters, batch 8.
    B, NIN, NH, NZ, NC = 8, 64, 32, 16, 8
    ALPHA = 1.0

    key = jax.random.PRNGKey(0)
    kx, kp = jax.random.split(key)
    x = jax.random.uniform(kx, (B, NIN), jnp.float32)   # MNIST-like pixels in [0,1)
    params = init_idec_params(kp, NIN, NH, NZ, NC)

    # pad / cast parameters ONCE (outside the step), then run the fused kernel
    padded_params, dims = prepare_params(params, matmul_dtype=jnp.bfloat16)
    z, q, x_hat = idec_forward(padded_params, dims, x, alpha=ALPHA)
    jax.block_until_ready((z, q, x_hat))

    # sanity check against the pure-JAX f32 reference (bf16 matmuls + approx
    # reciprocals in the kernel => relaxed tolerances)
    z_r, q_r, xh_r = idec_forward_ref(params, x, alpha=ALPHA)
    assert z.shape == (B, NZ) and q.shape == (B, NC) and x_hat.shape == (B, NIN)
    assert jnp.allclose(z, z_r, atol=5e-2, rtol=5e-2), float(jnp.max(jnp.abs(z - z_r)))
    assert jnp.allclose(x_hat, xh_r, atol=5e-2, rtol=5e-2), float(jnp.max(jnp.abs(x_hat - xh_r)))
    assert jnp.allclose(q, q_r, atol=1e-2, rtol=5e-2), float(jnp.max(jnp.abs(q - q_r)))
    assert bool(jnp.all(jnp.isfinite(q))) and bool(jnp.all(q >= 0.0))
    # rows of q sum to 1 (approx reciprocal in the normalization => 1e-2 tol)
    assert jnp.allclose(jnp.sum(q, axis=1), jnp.ones((B,)), atol=1e-2)

    print("KERNEL_OK")
</pallas_src>

<mosaic_0001>
module attributes {stable_mosaic.version = 11 : i64} {
  func.func @_idec_fused_kernel(%arg0: i32, %arg1: memref<16x128xbf16, #tpu.memory_space<vmem>>, %arg2: memref<128x128xbf16, #tpu.memory_space<vmem>>, %arg3: memref<1x128xf32, #tpu.memory_space<vmem>>, %arg4: memref<128x128xbf16, #tpu.memory_space<vmem>>, %arg5: memref<1x128xf32, #tpu.memory_space<vmem>>, %arg6: memref<128x128xbf16, #tpu.memory_space<vmem>>, %arg7: memref<1x128xf32, #tpu.memory_space<vmem>>, %arg8: memref<128x128xbf16, #tpu.memory_space<vmem>>, %arg9: memref<1x128xf32, #tpu.memory_space<vmem>>, %arg10: memref<128x128xbf16, #tpu.memory_space<vmem>>, %arg11: memref<1x128xf32, #tpu.memory_space<vmem>>, %arg12: memref<128x128xbf16, #tpu.memory_space<vmem>>, %arg13: memref<1x128xf32, #tpu.memory_space<vmem>>, %arg14: memref<128x128xbf16, #tpu.memory_space<vmem>>, %arg15: memref<1x128xf32, #tpu.memory_space<vmem>>, %arg16: memref<1x128xf32, #tpu.memory_space<vmem>>, %arg17: memref<16x128xf32, #tpu.memory_space<vmem>>, %arg18: memref<16x128xf32, #tpu.memory_space<vmem>>, %arg19: memref<16x128xf32, #tpu.memory_space<vmem>>) attributes {dimension_semantics = [#tpu.dimension_semantics<parallel>], iteration_bounds = array<i64: 1>, scalar_prefetch = 0 : i64, scratch_operands = 0 : i64, tpu.core_type = #tpu.core_type<tc>, window_params = [{transform_indices = @transform_0, window_bounds = array<i64: 16, 128>}, {pipeline_mode = #tpu.pipeline_mode<synchronous>, transform_indices = @transform_1, window_bounds = array<i64: 128, 128>}, {pipeline_mode = #tpu.pipeline_mode<synchronous>, transform_indices = @transform_2, window_bounds = array<i64: 1, 128>}, {pipeline_mode = #tpu.pipeline_mode<synchronous>, transform_indices = @transform_3, window_bounds = array<i64: 128, 128>}, {pipeline_mode = #tpu.pipeline_mode<synchronous>, transform_indices = @transform_4, window_bounds = array<i64: 1, 128>}, {pipeline_mode = #tpu.pipeline_mode<synchronous>, transform_indices = @transform_5, window_bounds = array<i64: 128, 128>}, {pipeline_mode = #tpu.pipeline_mode<synchronous>, transform_indices = @transform_6, window_bounds = array<i64: 1, 128>}, {pipeline_mode = #tpu.pipeline_mode<synchronous>, transform_indices = @transform_7, window_bounds = array<i64: 128, 128>}, {pipeline_mode = #tpu.pipeline_mode<synchronous>, transform_indices = @transform_8, window_bounds = array<i64: 1, 128>}, {pipeline_mode = #tpu.pipeline_mode<synchronous>, transform_indices = @transform_9, window_bounds = array<i64: 128, 128>}, {pipeline_mode = #tpu.pipeline_mode<synchronous>, transform_indices = @transform_10, window_bounds = array<i64: 1, 128>}, {pipeline_mode = #tpu.pipeline_mode<synchronous>, transform_indices = @transform_11, window_bounds = array<i64: 128, 128>}, {pipeline_mode = #tpu.pipeline_mode<synchronous>, transform_indices = @transform_12, window_bounds = array<i64: 1, 128>}, {pipeline_mode = #tpu.pipeline_mode<synchronous>, transform_indices = @transform_13, window_bounds = array<i64: 128, 128>}, {pipeline_mode = #tpu.pipeline_mode<synchronous>, transform_indices = @transform_14, window_bounds = array<i64: 1, 128>}, {pipeline_mode = #tpu.pipeline_mode<synchronous>, transform_indices = @transform_15, window_bounds = array<i64: 1, 128>}, {transform_indices = @transform_16, window_bounds = array<i64: 16, 128>}, {transform_indices = @transform_17, window_bounds = array<i64: 16, 128>}, {transform_indices = @transform_18, window_bounds = array<i64: 16, 128>}]} {
    %c0 = arith.constant 0 : index
    %c0_0 = arith.constant 0 : index
    %0 = vector.load %arg1[%c0, %c0_0] : memref<16x128xbf16, #tpu.memory_space<vmem>>, vector<16x128xbf16>
    %c0_1 = arith.constant 0 : index
    %c0_2 = arith.constant 0 : index
    %1 = vector.load %arg2[%c0_1, %c0_2] : memref<128x128xbf16, #tpu.memory_space<vmem>>, vector<128x128xbf16>
    %cst = arith.constant dense<0.000000e+00> : vector<16x128xf32>
    %2 = tpu.matmul %0, %1, %cst {dimension_numbers = #tpu.dot_dimension_numbers<[1], [0], [0], [1], [0, 0, 1, 1], [], []>} : vector<16x128xbf16>, vector<128x128xbf16>, vector<16x128xf32> -> vector<16x128xf32>
    %c0_3 = arith.constant 0 : index
    %c0_4 = arith.constant 0 : index
    %3 = vector.load %arg3[%c0_3, %c0_4] : memref<1x128xf32, #tpu.memory_space<vmem>>, vector<1x128xf32>
    %4 = vector.broadcast %3 : vector<1x128xf32> to vector<16x128xf32>
    %5 = arith.addf %2, %4 : vector<16x128xf32>
    %cst_5 = arith.constant 0.000000e+00 : f32
    %6 = vector.broadcast %cst_5 : f32 to vector<16x128xf32>
    %7 = arith.maximumf %5, %6 : vector<16x128xf32>
    %8 = arith.truncf %7 : vector<16x128xf32> to vector<16x128xbf16>
    %c0_6 = arith.constant 0 : index
    %c0_7 = arith.constant 0 : index
    %9 = vector.load %arg4[%c0_6, %c0_7] : memref<128x128xbf16, #tpu.memory_space<vmem>>, vector<128x128xbf16>
    %cst_8 = arith.constant dense<0.000000e+00> : vector<16x128xf32>
    %10 = tpu.matmul %8, %9, %cst_8 {dimension_numbers = #tpu.dot_dimension_numbers<[1], [0], [0], [1], [0, 0, 1, 1], [], []>} : vector<16x128xbf16>, vector<128x128xbf16>, vector<16x128xf32> -> vector<16x128xf32>
    %c0_9 = arith.constant 0 : index
    %c0_10 = arith.constant 0 : index
    %11 = vector.load %arg5[%c0_9, %c0_10] : memref<1x128xf32, #tpu.memory_space<vmem>>, vector<1x128xf32>
    %12 = vector.broadcast %11 : vector<1x128xf32> to vector<16x128xf32>
    %13 = arith.addf %10, %12 : vector<16x128xf32>
    %cst_11 = arith.constant 0.000000e+00 : f32
    %14 = vector.broadcast %cst_11 : f32 to vector<16x128xf32>
    %15 = arith.maximumf %13, %14 : vector<16x128xf32>
    %16 = arith.truncf %15 : vector<16x128xf32> to vector<16x128xbf16>
    %c0_12 = arith.constant 0 : index
    %c0_13 = arith.constant 0 : index
    %17 = vector.load %arg6[%c0_12, %c0_13] : memref<128x128xbf16, #tpu.memory_space<vmem>>, vector<128x128xbf16>
    %cst_14 = arith.constant dense<0.000000e+00> : vector<16x128xf32>
    %18 = tpu.matmul %16, %17, %cst_14 {dimension_numbers = #tpu.dot_dimension_numbers<[1], [0], [0], [1], [0, 0, 1, 1], [], []>} : vector<16x128xbf16>, vector<128x128xbf16>, vector<16x128xf32> -> vector<16x128xf32>
    %c0_15 = arith.constant 0 : index
    %c0_16 = arith.constant 0 : index
    %19 = vector.load %arg7[%c0_15, %c0_16] : memref<1x128xf32, #tpu.memory_space<vmem>>, vector<1x128xf32>
    %20 = vector.broadcast %19 : vector<1x128xf32> to vector<16x128xf32>
    %21 = arith.addf %18, %20 : vector<16x128xf32>
    %22 = arith.truncf %21 : vector<16x128xf32> to vector<16x128xbf16>
    %c0_17 = arith.constant 0 : index
    %c0_18 = arith.constant 0 : index
    %23 = vector.load %arg8[%c0_17, %c0_18] : memref<128x128xbf16, #tpu.memory_space<vmem>>, vector<128x128xbf16>
    %cst_19 = arith.constant dense<0.000000e+00> : vector<16x128xf32>
    %24 = tpu.matmul %22, %23, %cst_19 {dimension_numbers = #tpu.dot_dimension_numbers<[1], [0], [0], [1], [0, 0, 1, 1], [], []>} : vector<16x128xbf16>, vector<128x128xbf16>, vector<16x128xf32> -> vector<16x128xf32>
    %c0_20 = arith.constant 0 : index
    %c0_21 = arith.constant 0 : index
    %25 = vector.load %arg9[%c0_20, %c0_21] : memref<1x128xf32, #tpu.memory_space<vmem>>, vector<1x128xf32>
    %26 = vector.broadcast %25 : vector<1x128xf32> to vector<16x128xf32>
    %27 = arith.addf %24, %26 : vector<16x128xf32>
    %cst_22 = arith.constant 0.000000e+00 : f32
    %28 = vector.broadcast %cst_22 : f32 to vector<16x128xf32>
    %29 = arith.maximumf %27, %28 : vector<16x128xf32>
    %30 = arith.truncf %29 : vector<16x128xf32> to vector<16x128xbf16>
    %c0_23 = arith.constant 0 : index
    %c0_24 = arith.constant 0 : index
    %31 = vector.load %arg10[%c0_23, %c0_24] : memref<128x128xbf16, #tpu.memory_space<vmem>>, vector<128x128xbf16>
    %cst_25 = arith.constant dense<0.000000e+00> : vector<16x128xf32>
    %32 = tpu.matmul %30, %31, %cst_25 {dimension_numbers = #tpu.dot_dimension_numbers<[1], [0], [0], [1], [0, 0, 1, 1], [], []>} : vector<16x128xbf16>, vector<128x128xbf16>, vector<16x128xf32> -> vector<16x128xf32>
    %c0_26 = arith.constant 0 : index
    %c0_27 = arith.constant 0 : index
    %33 = vector.load %arg11[%c0_26, %c0_27] : memref<1x128xf32, #tpu.memory_space<vmem>>, vector<1x128xf32>
    %34 = vector.broadcast %33 : vector<1x128xf32> to vector<16x128xf32>
    %35 = arith.addf %32, %34 : vector<16x128xf32>
    %cst_28 = arith.constant 0.000000e+00 : f32
    %36 = vector.broadcast %cst_28 : f32 to vector<16x128xf32>
    %37 = arith.maximumf %35, %36 : vector<16x128xf32>
    %38 = arith.truncf %37 : vector<16x128xf32> to vector<16x128xbf16>
    %c0_29 = arith.constant 0 : index
    %c0_30 = arith.constant 0 : index
    %39 = vector.load %arg12[%c0_29, %c0_30] : memref<128x128xbf16, #tpu.memory_space<vmem>>, vector<128x128xbf16>
    %cst_31 = arith.constant dense<0.000000e+00> : vector<16x128xf32>
    %40 = tpu.matmul %38, %39, %cst_31 {dimension_numbers = #tpu.dot_dimension_numbers<[1], [0], [0], [1], [0, 0, 1, 1], [], []>} : vector<16x128xbf16>, vector<128x128xbf16>, vector<16x128xf32> -> vector<16x128xf32>
    %c0_32 = arith.constant 0 : index
    %c0_33 = arith.constant 0 : index
    %41 = vector.load %arg13[%c0_32, %c0_33] : memref<1x128xf32, #tpu.memory_space<vmem>>, vector<1x128xf32>
    %42 = vector.broadcast %41 : vector<1x128xf32> to vector<16x128xf32>
    %43 = arith.addf %40, %42 : vector<16x128xf32>
    %c0_34 = arith.constant 0 : index
    %c0_35 = arith.constant 0 : index
    %44 = vector.load %arg17[%c0_34, %c0_35] : memref<16x128xf32, #tpu.memory_space<vmem>>, vector<16x128xf32>
    tpu.vector_store %arg17[%c0_34, %c0_35], %21 {strides = array<i32>} : memref<16x128xf32, #tpu.memory_space<vmem>>, vector<16x128xf32>,
    %c0_36 = arith.constant 0 : index
    %c0_37 = arith.constant 0 : index
    %45 = vector.load %arg19[%c0_36, %c0_37] : memref<16x128xf32, #tpu.memory_space<vmem>>, vector<16x128xf32>
    tpu.vector_store %arg19[%c0_36, %c0_37], %43 {strides = array<i32>} : memref<16x128xf32, #tpu.memory_space<vmem>>, vector<16x128xf32>,
    %46 = arith.mulf %21, %21 : vector<16x128xf32>
    %cst_38 = arith.constant dense<0.000000e+00> : vector<16xf32>
    %47 = vector.multi_reduction <add>, %46, %cst_38 [1] : vector<16x128xf32> to vector<16xf32>
    %48 = vector.shape_cast %47 : vector<16xf32> to vector<16x1xf32>
    %c0_39 = arith.constant 0 : index
    %c0_40 = arith.constant 0 : index
    %49 = vector.load %arg14[%c0_39, %c0_40] : memref<128x128xbf16, #tpu.memory_space<vmem>>, vector<128x128xbf16>
    %cst_41 = arith.constant dense<0.000000e+00> : vector<16x128xf32>
    %50 = tpu.matmul %22, %49, %cst_41 {dimension_numbers = #tpu.dot_dimension_numbers<[1], [0], [0], [1], [0, 0, 1, 1], [], []>} : vector<16x128xbf16>, vector<128x128xbf16>, vector<16x128xf32> -> vector<16x128xf32>
    %c0_42 = arith.constant 0 : index
    %c0_43 = arith.constant 0 : index
    %51 = vector.load %arg15[%c0_42, %c0_43] : memref<1x128xf32, #tpu.memory_space<vmem>>, vector<1x128xf32>
    %52 = vector.broadcast %48 : vector<16x1xf32> to vector<16x128xf32>
    %53 = vector.broadcast %51 : vector<1x128xf32> to vector<16x128xf32>
    %54 = arith.addf %52, %53 : vector<16x128xf32>
    %cst_44 = arith.constant 2.000000e+00 : f32
    %55 = vector.broadcast %cst_44 : f32 to vector<16x128xf32>
    %56 = arith.mulf %55, %50 : vector<16x128xf32>
    %57 = arith.subf %54, %56 : vector<16x128xf32>
    %cst_45 = arith.constant 0.000000e+00 : f32
    %58 = vector.broadcast %cst_45 : f32 to vector<16x128xf32>
    %59 = arith.maximumf %57, %58 : vector<16x128xf32>
    %cst_46 = arith.constant 1.000000e+00 : f32
    %60 = vector.broadcast %cst_46 : f32 to vector<16x128xf32>
    %61 = arith.addf %60, %59 : vector<16x128xf32>
    %62 = tpu.reciprocal %61 {approx = true} : vector<16x128xf32> -> vector<16x128xf32>
    %63 = arith.mulf %62, %62 : vector<16x128xf32>
    %c0_47 = arith.constant 0 : index
    %c0_48 = arith.constant 0 : index
    %64 = vector.load %arg16[%c0_47, %c0_48] : memref<1x128xf32, #tpu.memory_space<vmem>>, vector<1x128xf32>
    %65 = vector.broadcast %64 : vector<1x128xf32> to vector<16x128xf32>
    %66 = arith.mulf %63, %65 : vector<16x128xf32>
    %cst_49 = arith.constant dense<0.000000e+00> : vector<16xf32>
    %67 = vector.multi_reduction <add>, %66, %cst_49 [1] : vector<16x128xf32> to vector<16xf32>
    %68 = vector.shape_cast %67 : vector<16xf32> to vector<16x1xf32>
    %69 = tpu.reciprocal %68 {approx = true} : vector<16x1xf32> -> vector<16x1xf32>
    %70 = vector.broadcast %69 : vector<16x1xf32> to vector<16x128xf32>
    %71 = arith.mulf %66, %70 : vector<16x128xf32>
    %c0_50 = arith.constant 0 : index
    %c0_51 = arith.constant 0 : index
    %72 = vector.load %arg18[%c0_50, %c0_51] : memref<16x128xf32, #tpu.memory_space<vmem>>, vector<16x128xf32>
    tpu.vector_store %arg18[%c0_50, %c0_51], %71 {strides = array<i32>} : memref<16x128xf32, #tpu.memory_space<vmem>>, vector<16x128xf32>,
    return
  }
  func.func @transform_0(%arg0: i32) -> (i32, i32) {
    %c0_i32 = arith.constant 0 : i32
    %c0_i32_0 = arith.constant 0 : i32
    return %arg0, %c0_i32 : i32, i32
  }
  func.func @transform_1(%arg0: i32) -> (i32, i32) {
    %c0_i32 = arith.constant 0 : i32
    %c0_i32_0 = arith.constant 0 : i32
    %c0_i32_1 = arith.constant 0 : i32
    return %c0_i32, %c0_i32_0 : i32, i32
  }
  func.func @transform_2(%arg0: i32) -> (i32, i32) {
    %c0_i32 = arith.constant 0 : i32
    %c0_i32_0 = arith.constant 0 : i32
    %c0_i32_1 = arith.constant 0 : i32
    return %c0_i32, %c0_i32_0 : i32, i32
  }
  func.func @transform_3(%arg0: i32) -> (i32, i32) {
    %c0_i32 = arith.constant 0 : i32
    %c0_i32_0 = arith.constant 0 : i32
    %c0_i32_1 = arith.constant 0 : i32
    return %c0_i32, %c0_i32_0 : i32, i32
  }
  func.func @transform_4(%arg0: i32) -> (i32, i32) {
    %c0_i32 = arith.constant 0 : i32
    %c0_i32_0 = arith.constant 0 : i32
    %c0_i32_1 = arith.constant 0 : i32
    return %c0_i32, %c0_i32_0 : i32, i32
  }
  func.func @transform_5(%arg0: i32) -> (i32, i32) {
    %c0_i32 = arith.constant 0 : i32
    %c0_i32_0 = arith.constant 0 : i32
    %c0_i32_1 = arith.constant 0 : i32
    return %c0_i32, %c0_i32_0 : i32, i32
  }
  func.func @transform_6(%arg0: i32) -> (i32, i32) {
    %c0_i32 = arith.constant 0 : i32
    %c0_i32_0 = arith.constant 0 : i32
    %c0_i32_1 = arith.constant 0 : i32
    return %c0_i32, %c0_i32_0 : i32, i32
  }
  func.func @transform_7(%arg0: i32) -> (i32, i32) {
    %c0_i32 = arith.constant 0 : i32
    %c0_i32_0 = arith.constant 0 : i32
    %c0_i32_1 = arith.constant 0 : i32
    return %c0_i32, %c0_i32_0 : i32, i32
  }
  func.func @transform_8(%arg0: i32) -> (i32, i32) {
    %c0_i32 = arith.constant 0 : i32
    %c0_i32_0 = arith.constant 0 : i32
    %c0_i32_1 = arith.constant 0 : i32
    return %c0_i32, %c0_i32_0 : i32, i32
  }
  func.func @transform_9(%arg0: i32) -> (i32, i32) {
    %c0_i32 = arith.constant 0 : i32
    %c0_i32_0 = arith.constant 0 : i32
    %c0_i32_1 = arith.constant 0 : i32
    return %c0_i32, %c0_i32_0 : i32, i32
  }
  func.func @transform_10(%arg0: i32) -> (i32, i32) {
    %c0_i32 = arith.constant 0 : i32
    %c0_i32_0 = arith.constant 0 : i32
    %c0_i32_1 = arith.constant 0 : i32
    return %c0_i32, %c0_i32_0 : i32, i32
  }
  func.func @transform_11(%arg0: i32) -> (i32, i32) {
    %c0_i32 = arith.constant 0 : i32
    %c0_i32_0 = arith.constant 0 : i32
    %c0_i32_1 = arith.constant 0 : i32
    return %c0_i32, %c0_i32_0 : i32, i32
  }
  func.func @transform_12(%arg0: i32) -> (i32, i32) {
    %c0_i32 = arith.constant 0 : i32
    %c0_i32_0 = arith.constant 0 : i32
    %c0_i32_1 = arith.constant 0 : i32
    return %c0_i32, %c0_i32_0 : i32, i32
  }
  func.func @transform_13(%arg0: i32) -> (i32, i32) {
    %c0_i32 = arith.constant 0 : i32
    %c0_i32_0 = arith.constant 0 : i32
    %c0_i32_1 = arith.constant 0 : i32
    return %c0_i32, %c0_i32_0 : i32, i32
  }
  func.func @transform_14(%arg0: i32) -> (i32, i32) {
    %c0_i32 = arith.constant 0 : i32
    %c0_i32_0 = arith.constant 0 : i32
    %c0_i32_1 = arith.constant 0 : i32
    return %c0_i32, %c0_i32_0 : i32, i32
  }
  func.func @transform_15(%arg0: i32) -> (i32, i32) {
    %c0_i32 = arith.constant 0 : i32
    %c0_i32_0 = arith.constant 0 : i32
    %c0_i32_1 = arith.constant 0 : i32
    return %c0_i32, %c0_i32_0 : i32, i32
  }
  func.func @transform_16(%arg0: i32) -> (i32, i32) {
    %c0_i32 = arith.constant 0 : i32
    %c0_i32_0 = arith.constant 0 : i32
    return %arg0, %c0_i32 : i32, i32
  }
  func.func @transform_17(%arg0: i32) -> (i32, i32) {
    %c0_i32 = arith.constant 0 : i32
    %c0_i32_0 = arith.constant 0 : i32
    return %arg0, %c0_i32 : i32, i32
  }
  func.func @transform_18(%arg0: i32) -> (i32, i32) {
    %c0_i32 = arith.constant 0 : i32
    %c0_i32_0 = arith.constant 0 : i32
    return %arg0, %c0_i32 : i32, i32
  }
}

module attributes {stable_mosaic.version = 11 : i64} {
  func.func @_idec_fused_kernel(%arg0: i32, %arg1: memref<16x128xbf16, #tpu.memory_space<vmem>>, %arg2: memref<128x128xbf16, #tpu.memory_space<vmem>>, %arg3: memref<1x128xf32, #tpu.memory_space<vmem>>, %arg4: memref<128x128xbf16, #tpu.memory_space<vmem>>, %arg5: memref<1x128xf32, #tpu.memory_space<vmem>>, %arg6: memref<128x128xbf16, #tpu.memory_space<vmem>>, %arg7: memref<1x128xf32, #tpu.memory_space<vmem>>, %arg8: memref<128x128xbf16, #tpu.memory_space<vmem>>, %arg9: memref<1x128xf32, #tpu.memory_space<vmem>>, %arg10: memref<128x128xbf16, #tpu.memory_space<vmem>>, %arg11: memref<1x128xf32, #tpu.memory_space<vmem>>, %arg12: memref<128x128xbf16, #tpu.memory_space<vmem>>, %arg13: memref<1x128xf32, #tpu.memory_space<vmem>>, %arg14: memref<128x128xbf16, #tpu.memory_space<vmem>>, %arg15: memref<1x128xf32, #tpu.memory_space<vmem>>, %arg16: memref<1x128xf32, #tpu.memory_space<vmem>>, %arg17: memref<16x128xf32, #tpu.memory_space<vmem>>, %arg18: memref<16x128xf32, #tpu.memory_space<vmem>>, %arg19: memref<16x128xf32, #tpu.memory_space<vmem>>) attributes {dimension_semantics = [#tpu.dimension_semantics<parallel>], iteration_bounds = array<i64: 1>, scalar_prefetch = 0 : i64, scratch_operands = 0 : i64, tpu.core_type = #tpu.core_type<tc>, window_params = [{transform_indices = @transform_0, window_bounds = array<i64: 16, 128>}, {pipeline_mode = #tpu.pipeline_mode<synchronous>, transform_indices = @transform_1, window_bounds = array<i64: 128, 128>}, {pipeline_mode = #tpu.pipeline_mode<synchronous>, transform_indices = @transform_2, window_bounds = array<i64: 1, 128>}, {pipeline_mode = #tpu.pipeline_mode<synchronous>, transform_indices = @transform_3, window_bounds = array<i64: 128, 128>}, {pipeline_mode = #tpu.pipeline_mode<synchronous>, transform_indices = @transform_4, window_bounds = array<i64: 1, 128>}, {pipeline_mode = #tpu.pipeline_mode<synchronous>, transform_indices = @transform_5, window_bounds = array<i64: 128, 128>}, {pipeline_mode = #tpu.pipeline_mode<synchronous>, transform_indices = @transform_6, window_bounds = array<i64: 1, 128>}, {pipeline_mode = #tpu.pipeline_mode<synchronous>, transform_indices = @transform_7, window_bounds = array<i64: 128, 128>}, {pipeline_mode = #tpu.pipeline_mode<synchronous>, transform_indices = @transform_8, window_bounds = array<i64: 1, 128>}, {pipeline_mode = #tpu.pipeline_mode<synchronous>, transform_indices = @transform_9, window_bounds = array<i64: 128, 128>}, {pipeline_mode = #tpu.pipeline_mode<synchronous>, transform_indices = @transform_10, window_bounds = array<i64: 1, 128>}, {pipeline_mode = #tpu.pipeline_mode<synchronous>, transform_indices = @transform_11, window_bounds = array<i64: 128, 128>}, {pipeline_mode = #tpu.pipeline_mode<synchronous>, transform_indices = @transform_12, window_bounds = array<i64: 1, 128>}, {pipeline_mode = #tpu.pipeline_mode<synchronous>, transform_indices = @transform_13, window_bounds = array<i64: 128, 128>}, {pipeline_mode = #tpu.pipeline_mode<synchronous>, transform_indices = @transform_14, window_bounds = array<i64: 1, 128>}, {pipeline_mode = #tpu.pipeline_mode<synchronous>, transform_indices = @transform_15, window_bounds = array<i64: 1, 128>}, {transform_indices = @transform_16, window_bounds = array<i64: 16, 128>}, {transform_indices = @transform_17, window_bounds = array<i64: 16, 128>}, {transform_indices = @transform_18, window_bounds = array<i64: 16, 128>}]} {
    %c0 = arith.constant 0 : index
    %c0_0 = arith.constant 0 : index
    %0 = vector.load %arg1[%c0, %c0_0] : memref<16x128xbf16, #tpu.memory_space<vmem>>, vector<16x128xbf16>
    %c0_1 = arith.constant 0 : index
    %c0_2 = arith.constant 0 : index
    %1 = vector.load %arg2[%c0_1, %c0_2] : memref<128x128xbf16, #tpu.memory_space<vmem>>, vector<128x128xbf16>
    %cst = arith.constant dense<0.000000e+00> : vector<16x128xf32>
    %2 = tpu.matmul %0, %1, %cst {dimension_numbers = #tpu.dot_dimension_numbers<[1], [0], [0], [1], [0, 0, 1, 1], [], []>} : vector<16x128xbf16>, vector<128x128xbf16>, vector<16x128xf32> -> vector<16x128xf32>
    %c0_3 = arith.constant 0 : index
    %c0_4 = arith.constant 0 : index
    %3 = vector.load %arg3[%c0_3, %c0_4] : memref<1x128xf32, #tpu.memory_space<vmem>>, vector<1x128xf32>
    %4 = vector.broadcast %3 : vector<1x128xf32> to vector<16x128xf32>
    %5 = arith.addf %2, %4 : vector<16x128xf32>
    %cst_5 = arith.constant 0.000000e+00 : f32
    %6 = vector.broadcast %cst_5 : f32 to vector<16x128xf32>
    %7 = arith.maximumf %5, %6 : vector<16x128xf32>
    %8 = arith.truncf %7 : vector<16x128xf32> to vector<16x128xbf16>
    %c0_6 = arith.constant 0 : index
    %c0_7 = arith.constant 0 : index
    %9 = vector.load %arg4[%c0_6, %c0_7] : memref<128x128xbf16, #tpu.memory_space<vmem>>, vector<128x128xbf16>
    %cst_8 = arith.constant dense<0.000000e+00> : vector<16x128xf32>
    %10 = tpu.matmul %8, %9, %cst_8 {dimension_numbers = #tpu.dot_dimension_numbers<[1], [0], [0], [1], [0, 0, 1, 1], [], []>} : vector<16x128xbf16>, vector<128x128xbf16>, vector<16x128xf32> -> vector<16x128xf32>
    %c0_9 = arith.constant 0 : index
    %c0_10 = arith.constant 0 : index
    %11 = vector.load %arg5[%c0_9, %c0_10] : memref<1x128xf32, #tpu.memory_space<vmem>>, vector<1x128xf32>
    %12 = vector.broadcast %11 : vector<1x128xf32> to vector<16x128xf32>
    %13 = arith.addf %10, %12 : vector<16x128xf32>
    %cst_11 = arith.constant 0.000000e+00 : f32
    %14 = vector.broadcast %cst_11 : f32 to vector<16x128xf32>
    %15 = arith.maximumf %13, %14 : vector<16x128xf32>
    %16 = arith.truncf %15 : vector<16x128xf32> to vector<16x128xbf16>
    %c0_12 = arith.constant 0 : index
    %c0_13 = arith.constant 0 : index
    %17 = vector.load %arg6[%c0_12, %c0_13] : memref<128x128xbf16, #tpu.memory_space<vmem>>, vector<128x128xbf16>
    %cst_14 = arith.constant dense<0.000000e+00> : vector<16x128xf32>
    %18 = tpu.matmul %16, %17, %cst_14 {dimension_numbers = #tpu.dot_dimension_numbers<[1], [0], [0], [1], [0, 0, 1, 1], [], []>} : vector<16x128xbf16>, vector<128x128xbf16>, vector<16x128xf32> -> vector<16x128xf32>
    %c0_15 = arith.constant 0 : index
    %c0_16 = arith.constant 0 : index
    %19 = vector.load %arg7[%c0_15, %c0_16] : memref<1x128xf32, #tpu.memory_space<vmem>>, vector<1x128xf32>
    %20 = vector.broadcast %19 : vector<1x128xf32> to vector<16x128xf32>
    %21 = arith.addf %18, %20 : vector<16x128xf32>
    %22 = arith.truncf %21 : vector<16x128xf32> to vector<16x128xbf16>
    %c0_17 = arith.constant 0 : index
    %c0_18 = arith.constant 0 : index
    %23 = vector.load %arg8[%c0_17, %c0_18] : memref<128x128xbf16, #tpu.memory_space<vmem>>, vector<128x128xbf16>
    %cst_19 = arith.constant dense<0.000000e+00> : vector<16x128xf32>
    %24 = tpu.matmul %22, %23, %cst_19 {dimension_numbers = #tpu.dot_dimension_numbers<[1], [0], [0], [1], [0, 0, 1, 1], [], []>} : vector<16x128xbf16>, vector<128x128xbf16>, vector<16x128xf32> -> vector<16x128xf32>
    %c0_20 = arith.constant 0 : index
    %c0_21 = arith.constant 0 : index
    %25 = vector.load %arg9[%c0_20, %c0_21] : memref<1x128xf32, #tpu.memory_space<vmem>>, vector<1x128xf32>
    %26 = vector.broadcast %25 : vector<1x128xf32> to vector<16x128xf32>
    %27 = arith.addf %24, %26 : vector<16x128xf32>
    %cst_22 = arith.constant 0.000000e+00 : f32
    %28 = vector.broadcast %cst_22 : f32 to vector<16x128xf32>
    %29 = arith.maximumf %27, %28 : vector<16x128xf32>
    %30 = arith.truncf %29 : vector<16x128xf32> to vector<16x128xbf16>
    %c0_23 = arith.constant 0 : index
    %c0_24 = arith.constant 0 : index
    %31 = vector.load %arg10[%c0_23, %c0_24] : memref<128x128xbf16, #tpu.memory_space<vmem>>, vector<128x128xbf16>
    %cst_25 = arith.constant dense<0.000000e+00> : vector<16x128xf32>
    %32 = tpu.matmul %30, %31, %cst_25 {dimension_numbers = #tpu.dot_dimension_numbers<[1], [0], [0], [1], [0, 0, 1, 1], [], []>} : vector<16x128xbf16>, vector<128x128xbf16>, vector<16x128xf32> -> vector<16x128xf32>
    %c0_26 = arith.constant 0 : index
    %c0_27 = arith.constant 0 : index
    %33 = vector.load %arg11[%c0_26, %c0_27] : memref<1x128xf32, #tpu.memory_space<vmem>>, vector<1x128xf32>
    %34 = vector.broadcast %33 : vector<1x128xf32> to vector<16x128xf32>
    %35 = arith.addf %32, %34 : vector<16x128xf32>
    %cst_28 = arith.constant 0.000000e+00 : f32
    %36 = vector.broadcast %cst_28 : f32 to vector<16x128xf32>
    %37 = arith.maximumf %35, %36 : vector<16x128xf32>
    %38 = arith.truncf %37 : vector<16x128xf32> to vector<16x128xbf16>
    %c0_29 = arith.constant 0 : index
    %c0_30 = arith.constant 0 : index
    %39 = vector.load %arg12[%c0_29, %c0_30] : memref<128x128xbf16, #tpu.memory_space<vmem>>, vector<128x128xbf16>
    %cst_31 = arith.constant dense<0.000000e+00> : vector<16x128xf32>
    %40 = tpu.matmul %38, %39, %cst_31 {dimension_numbers = #tpu.dot_dimension_numbers<[1], [0], [0], [1], [0, 0, 1, 1], [], []>} : vector<16x128xbf16>, vector<128x128xbf16>, vector<16x128xf32> -> vector<16x128xf32>
    %c0_32 = arith.constant 0 : index
    %c0_33 = arith.constant 0 : index
    %41 = vector.load %arg13[%c0_32, %c0_33] : memref<1x128xf32, #tpu.memory_space<vmem>>, vector<1x128xf32>
    %42 = vector.broadcast %41 : vector<1x128xf32> to vector<16x128xf32>
    %43 = arith.addf %40, %42 : vector<16x128xf32>
    %c0_34 = arith.constant 0 : index
    %c0_35 = arith.constant 0 : index
    %44 = vector.load %arg17[%c0_34, %c0_35] : memref<16x128xf32, #tpu.memory_space<vmem>>, vector<16x128xf32>
    tpu.vector_store %arg17[%c0_34, %c0_35], %21 {strides = array<i32>} : memref<16x128xf32, #tpu.memory_space<vmem>>, vector<16x128xf32>,
    %c0_36 = arith.constant 0 : index
    %c0_37 = arith.constant 0 : index
    %45 = vector.load %arg19[%c0_36, %c0_37] : memref<16x128xf32, #tpu.memory_space<vmem>>, vector<16x128xf32>
    tpu.vector_store %arg19[%c0_36, %c0_37], %43 {strides = array<i32>} : memref<16x128xf32, #tpu.memory_space<vmem>>, vector<16x128xf32>,
    %46 = arith.mulf %21, %21 : vector<16x128xf32>
    %cst_38 = arith.constant dense<0.000000e+00> : vector<16xf32>
    %47 = vector.multi_reduction <add>, %46, %cst_38 [1] : vector<16x128xf32> to vector<16xf32>
    %48 = vector.shape_cast %47 : vector<16xf32> to vector<16x1xf32>
    %c0_39 = arith.constant 0 : index
    %c0_40 = arith.constant 0 : index
    %49 = vector.load %arg14[%c0_39, %c0_40] : memref<128x128xbf16, #tpu.memory_space<vmem>>, vector<128x128xbf16>
    %cst_41 = arith.constant dense<0.000000e+00> : vector<16x128xf32>
    %50 = tpu.matmul %22, %49, %cst_41 {dimension_numbers = #tpu.dot_dimension_numbers<[1], [0], [0], [1], [0, 0, 1, 1], [], []>} : vector<16x128xbf16>, vector<128x128xbf16>, vector<16x128xf32> -> vector<16x128xf32>
    %c0_42 = arith.constant 0 : index
    %c0_43 = arith.constant 0 : index
    %51 = vector.load %arg15[%c0_42, %c0_43] : memref<1x128xf32, #tpu.memory_space<vmem>>, vector<1x128xf32>
    %52 = vector.broadcast %48 : vector<16x1xf32> to vector<16x128xf32>
    %53 = vector.broadcast %51 : vector<1x128xf32> to vector<16x128xf32>
    %54 = arith.addf %52, %53 : vector<16x128xf32>
    %cst_44 = arith.constant 2.000000e+00 : f32
    %55 = vector.broadcast %cst_44 : f32 to vector<16x128xf32>
    %56 = arith.mulf %55, %50 : vector<16x128xf32>
    %57 = arith.subf %54, %56 : vector<16x128xf32>
    %cst_45 = arith.constant 0.000000e+00 : f32
    %58 = vector.broadcast %cst_45 : f32 to vector<16x128xf32>
    %59 = arith.maximumf %57, %58 : vector<16x128xf32>
    %cst_46 = arith.constant 1.000000e+00 : f32
    %60 = vector.broadcast %cst_46 : f32 to vector<16x128xf32>
    %61 = arith.addf %60, %59 : vector<16x128xf32>
    %62 = tpu.reciprocal %61 {approx = true} : vector<16x128xf32> -> vector<16x128xf32>
    %63 = arith.mulf %62, %62 : vector<16x128xf32>
    %c0_47 = arith.constant 0 : index
    %c0_48 = arith.constant 0 : index
    %64 = vector.load %arg16[%c0_47, %c0_48] : memref<1x128xf32, #tpu.memory_space<vmem>>, vector<1x128xf32>
    %65 = vector.broadcast %64 : vector<1x128xf32> to vector<16x128xf32>
    %66 = arith.mulf %63, %65 : vector<16x128xf32>
    %cst_49 = arith.constant dense<0.000000e+00> : vector<16xf32>
    %67 = vector.multi_reduction <add>, %66, %cst_49 [1] : vector<16x128xf32> to vector<16xf32>
    %68 = vector.shape_cast %67 : vector<16xf32> to vector<16x1xf32>
    %69 = tpu.reciprocal %68 {approx = true} : vector<16x1xf32> -> vector<16x1xf32>
    %70 = vector.broadcast %69 : vector<16x1xf32> to vector<16x128xf32>
    %71 = arith.mulf %66, %70 : vector<16x128xf32>
    %c0_50 = arith.constant 0 : index
    %c0_51 = arith.constant 0 : index
    %72 = vector.load %arg18[%c0_50, %c0_51] : memref<16x128xf32, #tpu.memory_space<vmem>>, vector<16x128xf32>
    tpu.vector_store %arg18[%c0_50, %c0_51], %71 {strides = array<i32>} : memref<16x128xf32, #tpu.memory_space<vmem>>, vector<16x128xf32>,
    return
  }
  func.func @transform_0(%arg0: i32) -> (i32, i32) {
    %c0_i32 = arith.constant 0 : i32
    %c0_i32_0 = arith.constant 0 : i32
    return %arg0, %c0_i32 : i32, i32
  }
  func.func @transform_1(%arg0: i32) -> (i32, i32) {
    %c0_i32 = arith.constant 0 : i32
    %c0_i32_0 = arith.constant 0 : i32
    %c0_i32_1 = arith.constant 0 : i32
    return %c0_i32, %c0_i32_0 : i32, i32
  }
  func.func @transform_2(%arg0: i32) -> (i32, i32) {
    %c0_i32 = arith.constant 0 : i32
    %c0_i32_0 = arith.constant 0 : i32
    %c0_i32_1 = arith.constant 0 : i32
    return %c0_i32, %c0_i32_0 : i32, i32
  }
  func.func @transform_3(%arg0: i32) -> (i32, i32) {
    %c0_i32 = arith.constant 0 : i32
    %c0_i32_0 = arith.constant 0 : i32
    %c0_i32_1 = arith.constant 0 : i32
    return %c0_i32, %c0_i32_0 : i32, i32
  }
  func.func @transform_4(%arg0: i32) -> (i32, i32) {
    %c0_i32 = arith.constant 0 : i32
    %c0_i32_0 = arith.constant 0 : i32
    %c0_i32_1 = arith.constant 0 : i32
    return %c0_i32, %c0_i32_0 : i32, i32
  }
  func.func @transform_5(%arg0: i32) -> (i32, i32) {
    %c0_i32 = arith.constant 0 : i32
    %c0_i32_0 = arith.constant 0 : i32
    %c0_i32_1 = arith.constant 0 : i32
    return %c0_i32, %c0_i32_0 : i32, i32
  }
  func.func @transform_6(%arg0: i32) -> (i32, i32) {
    %c0_i32 = arith.constant 0 : i32
    %c0_i32_0 = arith.constant 0 : i32
    %c0_i32_1 = arith.constant 0 : i32
    return %c0_i32, %c0_i32_0 : i32, i32
  }
  func.func @transform_7(%arg0: i32) -> (i32, i32) {
    %c0_i32 = arith.constant 0 : i32
    %c0_i32_0 = arith.constant 0 : i32
    %c0_i32_1 = arith.constant 0 : i32
    return %c0_i32, %c0_i32_0 : i32, i32
  }
  func.func @transform_8(%arg0: i32) -> (i32, i32) {
    %c0_i32 = arith.constant 0 : i32
    %c0_i32_0 = arith.constant 0 : i32
    %c0_i32_1 = arith.constant 0 : i32
    return %c0_i32, %c0_i32_0 : i32, i32
  }
  func.func @transform_9(%arg0: i32) -> (i32, i32) {
    %c0_i32 = arith.constant 0 : i32
    %c0_i32_0 = arith.constant 0 : i32
    %c0_i32_1 = arith.constant 0 : i32
    return %c0_i32, %c0_i32_0 : i32, i32
  }
  func.func @transform_10(%arg0: i32) -> (i32, i32) {
    %c0_i32 = arith.constant 0 : i32
    %c0_i32_0 = arith.constant 0 : i32
    %c0_i32_1 = arith.constant 0 : i32
    return %c0_i32, %c0_i32_0 : i32, i32
  }
  func.func @transform_11(%arg0: i32) -> (i32, i32) {
    %c0_i32 = arith.constant 0 : i32
    %c0_i32_0 = arith.constant 0 : i32
    %c0_i32_1 = arith.constant 0 : i32
    return %c0_i32, %c0_i32_0 : i32, i32
  }
  func.func @transform_12(%arg0: i32) -> (i32, i32) {
    %c0_i32 = arith.constant 0 : i32
    %c0_i32_0 = arith.constant 0 : i32
    %c0_i32_1 = arith.constant 0 : i32
    return %c0_i32, %c0_i32_0 : i32, i32
  }
  func.func @transform_13(%arg0: i32) -> (i32, i32) {
    %c0_i32 = arith.constant 0 : i32
    %c0_i32_0 = arith.constant 0 : i32
    %c0_i32_1 = arith.constant 0 : i32
    return %c0_i32, %c0_i32_0 : i32, i32
  }
  func.func @transform_14(%arg0: i32) -> (i32, i32) {
    %c0_i32 = arith.constant 0 : i32
    %c0_i32_0 = arith.constant 0 : i32
    %c0_i32_1 = arith.constant 0 : i32
    return %c0_i32, %c0_i32_0 : i32, i32
  }
  func.func @transform_15(%arg0: i32) -> (i32, i32) {
    %c0_i32 = arith.constant 0 : i32
    %c0_i32_0 = arith.constant 0 : i32
    %c0_i32_1 = arith.constant 0 : i32
    return %c0_i32, %c0_i32_0 : i32, i32
  }
  func.func @transform_16(%arg0: i32) -> (i32, i32) {
    %c0_i32 = arith.constant 0 : i32
    %c0_i32_0 = arith.constant 0 : i32
    return %arg0, %c0_i32 : i32, i32
  }
  func.func @transform_17(%arg0: i32) -> (i32, i32) {
    %c0_i32 = arith.constant 0 : i32
    %c0_i32_0 = arith.constant 0 : i32
    return %arg0, %c0_i32 : i32, i32
  }
  func.func @transform_18(%arg0: i32) -> (i32, i32) {
    %c0_i32 = arith.constant 0 : i32
    %c0_i32_0 = arith.constant 0 : i32
    return %arg0, %c0_i32 : i32, i32
  }
}

</mosaic_0001>

<bundles_post_ra>
// kernel: tpu_custom_call.1
= control target key start
LH: loop header
LB: loop body
LE: loop exit
PB: predicated region body
PF: predicated region fallthrough
CT: control target
= control target key end

     0   :  { %s2077_s0 = inlined_call_operand.hbm [shape: bf16[16,128], index: 0, kind: input, shape index: {}]   ;;  %s2078_s1 = inlined_call_operand.hbm [shape: bf16[128,128], index: 1, kind: input, shape index: {}]   ;;  %s2079_s2 = inlined_call_operand.vmem [shape: f32[1,128], index: 2, kind: input, shape index: {}]   ;;  %s2080_s3 = inlined_call_operand.hbm [shape: bf16[128,128], index: 3, kind: input, shape index: {}]   ;;  %s2081_s4 = inlined_call_operand.vmem [shape: f32[1,128], index: 4, kind: input, shape index: {}]   ;;  %s2082_s5 = inlined_call_operand.hbm [shape: bf16[128,128], index: 5, kind: input, shape index: {}]   ;;  %s2083_s6 = inlined_call_operand.vmem [shape: f32[1,128], index: 6, kind: input, shape index: {}]   ;;  %s2084_s7 = inlined_call_operand.hbm [shape: bf16[128,128], index: 7, kind: input, shape index: {}]   ;;  %s2085_s8 = inlined_call_operand.vmem [shape: f32[1,128], index: 8, kind: input, shape index: {}]   ;;  %s2086_s9 = inlined_call_operand.hbm [shape: bf16[128,128], index: 9, kind: input, shape index: {}]   ;;  %s2087_s10 = inlined_call_operand.vmem [shape: f32[1,128], index: 10, kind: input, shape index: {}]   ;;  %s2088_s11 = inlined_call_operand.hbm [shape: bf16[128,128], index: 11, kind: input, shape index: {}]   ;;  %s2089_s12 = inlined_call_operand.vmem [shape: f32[1,128], index: 12, kind: input, shape index: {}]   ;;  %s2090_s13 = inlined_call_operand.hbm [shape: bf16[128,128], index: 13, kind: input, shape index: {}]   ;;  %s2091_s14 = inlined_call_operand.vmem [shape: f32[1,128], index: 14, kind: input, shape index: {}]   ;;  %s2092_s15 = inlined_call_operand.vmem [shape: f32[1,128], index: 15, kind: input, shape index: {}]   ;;  %s2093_s16 = inlined_call_operand.hbm [shape: f32[16,128], index: 16, kind: output, shape index: {0}]   ;;  %s2094_s17 = inlined_call_operand.hbm [shape: f32[16,128], index: 17, kind: output, shape index: {1}]   ;;  %s2095_s18 = inlined_call_operand.hbm [shape: f32[16,128], index: 18, kind: output, shape index: {2}]  }
   0x1   :  { %2099 = sst [smem:[#allocation27_spill]] %s2077_s0 }
   0x2   :  { %2100 = sst [smem:[#allocation28_spill]] %s2078_s1 }
   0x3   :  { %2101 = sst [smem:[#allocation29_spill]] %s2079_s2 }
   0x4   :  { %2102 = sst [smem:[#allocation30_spill]] %s2095_s18 }
   0x5   :  { %24 = vsyncpa [#allocation3], 0 }
   0x6   :  { %25 = vsyncpa [#allocation6], 0 }
   0x7   :  { %26 = vsyncpa [#allocation9], 0 }
   0x8   :  { %27 = vsyncpa [#allocation12], 0 }
   0x9   :  { %28 = vsyncpa [#allocation15], 0 }
   0xa   :  { %29 = vsyncpa [#allocation4], 0 }
   0xb   :  { %30 = vsyncpa [#allocation18], 0  ;;  %s1674_s27 = smov [#allocation5]   ;;  %s1675_s29 = smov [#allocation8]  }
   0xc   :  { %s48_s28 = sshll.u32 %s1674_s27, 4  ;;  %s76_s30 = sshll.u32 %s1675_s29, 4  ;;  %s49_s28 = int_to_ptr.vmem [resolvable:$true] %s48_s28  ;;  %s1786_s30 = int_to_ptr.vmem [resolvable:$true] %s76_s30 }
   0xd   :  { %s2103_s1 = sld [smem:[#allocation28_spill]] }
  0x13   :  { %s1418_s20 = scalar_lea.hbm %s2103_s1, 1024 }
  0x14   :  { %p1419_p0 = scmp.ne.s32.totalorder %s2103_s1, %s1418_s20  ;;  %p1422_p1 = scmp.lt.u32.totalorder %s1418_s20, %s2103_s1 }
  0x16   :  { %p1424_p2 = pnand %p1422_p1, %p1419_p0 }
  0x18   :  { %1427 = shalt.err (!%p1424_p2)
}
  0x19   :  { %s1428_s24 = scalar_lea.vmem %s49_s28, 1024  ;;  %p1433_p4 = scmp.lt.s32.totalorder %s49_s28, %s49_s28 }
  0x1a   :  { %p1429_p3 = scmp.ne.s32.totalorder %s49_s28, %s1428_s24  ;;  %p1434_p5 = scmp.lt.s32.totalorder %s1428_s24, %s1428_s24 }
  0x1c   :  { %p1435_p6 = por %p1434_p5, %p1433_p4 }
  0x1e   :  { %p1436_p7 = pnand %p1435_p6, %p1429_p3 }
  0x20   :  { %1439 = shalt.err (!%p1436_p7)
}
  0x21   :  { %s1676_s25 = smov 64   ;;  %s1677_s26 = smov 4  }
  0x22   :  { %54 = dma.hbm_to_vmem [thread:$0]  %s2103_s1, 1024, %s49_s28, [#allocation6], %s1676_s25, %s1676_s25, %s1677_s26  }
  0x23   :  { %s1440_s20 = scalar_lea.hbm %s2082_s5, 1024 }
  0x24   :  { %p1441_p8 = scmp.ne.s32.totalorder %s2082_s5, %s1440_s20  ;;  %p1444_p9 = scmp.lt.u32.totalorder %s1440_s20, %s2082_s5 }
  0x26   :  { %p1446_p10 = pnand %p1444_p9, %p1441_p8 }
  0x28   :  { %1449 = shalt.err (!%p1446_p10)
}
  0x29   :  { %s1450_s24 = scalar_lea.vmem %s1786_s30, 1024  ;;  %p1455_p12 = scmp.lt.s32.totalorder %s1786_s30, %s1786_s30 }
  0x2a   :  { %p1451_p11 = scmp.ne.s32.totalorder %s1786_s30, %s1450_s24  ;;  %p1456_p13 = scmp.lt.s32.totalorder %s1450_s24, %s1450_s24 }
  0x2c   :  { %p1457_p0 = por %p1456_p13, %p1455_p12 }
  0x2e   :  { %p1458_p1 = pnand %p1457_p0, %p1451_p11 }
  0x30   :  { %1461 = shalt.err (!%p1458_p1)
}
  0x31   :  { %82 = dma.hbm_to_vmem [thread:$0]  %s2082_s5, 1024, %s1786_s30, [#allocation9], %s1676_s25, %s1676_s25, %s1677_s26  }
  0x32   :  { %s1678_s27 = smov [#allocation11]   ;;  %s1679_s0 = smov [#allocation2]  }
  0x33   :  { %s104_s29 = sshll.u32 %s1678_s27, 4  ;;  %s36_s19 = sshll.u32 %s1679_s0, 4  ;;  %s105_s29 = int_to_ptr.vmem [resolvable:$true] %s104_s29  ;;  %s1823_s19 = int_to_ptr.vmem [resolvable:$true] %s36_s19 }
  0x34   :  { %s1462_s22 = scalar_lea.hbm %s2086_s9, 1024 }
  0x35   :  { %p1463_p2 = scmp.ne.s32.totalorder %s2086_s9, %s1462_s22  ;;  %p1466_p3 = scmp.lt.u32.totalorder %s1462_s22, %s2086_s9 }
  0x37   :  { %p1468_p4 = pnand %p1466_p3, %p1463_p2 }
  0x39   :  { %1471 = shalt.err (!%p1468_p4)
}
  0x3a   :  { %s1472_s5 = scalar_lea.vmem %s105_s29, 1024  ;;  %p1477_p6 = scmp.lt.s32.totalorder %s105_s29, %s105_s29 }
  0x3b   :  { %p1473_p5 = scmp.ne.s32.totalorder %s105_s29, %s1472_s5  ;;  %p1478_p7 = scmp.lt.s32.totalorder %s1472_s5, %s1472_s5 }
  0x3d   :  { %p1479_p8 = por %p1478_p7, %p1477_p6 }
  0x3f   :  { %p1480_p9 = pnand %p1479_p8, %p1473_p5 }
  0x41   :  { %1483 = shalt.err (!%p1480_p9)
}
  0x42   :  { %110 = dma.hbm_to_vmem [thread:$0]  %s2086_s9, 1024, %s105_s29, [#allocation12], %s1676_s25, %s1676_s25, %s1677_s26  }
  0x43   :  { %s2104_s18 = sld [smem:[#allocation27_spill]] }
  0x49   :  { %s1484_s0 = scalar_lea.hbm %s2104_s18, 128 }
  0x4a   :  { %p1485_p10 = scmp.ne.s32.totalorder %s2104_s18, %s1484_s0  ;;  %p1488_p11 = scmp.lt.u32.totalorder %s1484_s0, %s2104_s18 }
  0x4c   :  { %p1490_p12 = pnand %p1488_p11, %p1485_p10 }
  0x4e   :  { %1493 = shalt.err (!%p1490_p12)
}
  0x4f   :  { %s1494_s23 = scalar_lea.vmem %s1823_s19, 128  ;;  %p1499_p0 = scmp.lt.s32.totalorder %s1823_s19, %s1823_s19 }
  0x50   :  { %p1495_p13 = scmp.ne.s32.totalorder %s1823_s19, %s1494_s23  ;;  %p1500_p1 = scmp.lt.s32.totalorder %s1494_s23, %s1494_s23 }
  0x52   :  { %p1501_p2 = por %p1500_p1, %p1499_p0 }
  0x54   :  { %p1502_p3 = pnand %p1501_p2, %p1495_p13 }
  0x56   :  { %1505 = shalt.err (!%p1502_p3)
}
  0x57   :  { %42 = dma.hbm_to_vmem [thread:$0]  %s2104_s18, 128, %s1823_s19, [#allocation3], %s1676_s25, %s1676_s25, %s1677_s26  }
  0x58   :  { %s1680_s24 = smov [#allocation7]   ;;  %s1681_s30 = smov [#allocation10]  }
  0x59   :  { %s62_s5 = sshll.u32 %s1680_s24, 4  ;;  %s90_s28 = sshll.u32 %s1681_s30, 4  ;;  %s63_s5 = int_to_ptr.vmem [resolvable:$true] %s62_s5  ;;  %s1860_s28 = int_to_ptr.vmem [resolvable:$true] %s90_s28 }
  0x5a   :  { %s1506_s0 = scalar_lea.hbm %s2080_s3, 1024 }
  0x5b   :  { %p1507_p4 = scmp.ne.s32.totalorder %s2080_s3, %s1506_s0  ;;  %p1510_p5 = scmp.lt.u32.totalorder %s1506_s0, %s2080_s3 }
  0x5d   :  { %p1512_p6 = pnand %p1510_p5, %p1507_p4 }
  0x5f   :  { %1515 = shalt.err (!%p1512_p6)
}
  0x60   :  { %s1516_s19 = scalar_lea.vmem %s63_s5, 1024  ;;  %p1521_p8 = scmp.lt.s32.totalorder %s63_s5, %s63_s5 }
  0x61   :  { %p1517_p7 = scmp.ne.s32.totalorder %s63_s5, %s1516_s19  ;;  %p1522_p9 = scmp.lt.s32.totalorder %s1516_s19, %s1516_s19 }
  0x63   :  { %p1523_p10 = por %p1522_p9, %p1521_p8 }
  0x65   :  { %p1524_p11 = pnand %p1523_p10, %p1517_p7 }
  0x67   :  { %1527 = shalt.err (!%p1524_p11)
}
  0x68   :  { %68 = dma.hbm_to_vmem [thread:$0]  %s2080_s3, 1024, %s63_s5, [#allocation6], %s1676_s25, %s1676_s25, %s1677_s26  }
  0x69   :  { %s1528_s24 = scalar_lea.hbm %s2084_s7, 1024 }
  0x6a   :  { %p1529_p12 = scmp.ne.s32.totalorder %s2084_s7, %s1528_s24  ;;  %p1532_p13 = scmp.lt.u32.totalorder %s1528_s24, %s2084_s7 }
  0x6c   :  { %p1534_p0 = pnand %p1532_p13, %p1529_p12 }
  0x6e   :  { %1537 = shalt.err (!%p1534_p0)
}
  0x6f   :  { %s1538_s20 = scalar_lea.vmem %s1860_s28, 1024  ;;  %p1543_p2 = scmp.lt.s32.totalorder %s1860_s28, %s1860_s28 }
  0x70   :  { %p1539_p1 = scmp.ne.s32.totalorder %s1860_s28, %s1538_s20  ;;  %p1544_p3 = scmp.lt.s32.totalorder %s1538_s20, %s1538_s20 }
  0x72   :  { %p1545_p4 = por %p1544_p3, %p1543_p2 }
  0x74   :  { %p1546_p5 = pnand %p1545_p4, %p1539_p1 }
  0x76   :  { %1549 = shalt.err (!%p1546_p5)
}
  0x77   :  { %96 = dma.hbm_to_vmem [thread:$0]  %s2084_s7, 1024, %s1860_s28, [#allocation9], %s1676_s25, %s1676_s25, %s1677_s26  }
  0x78   :  { %s1682_s21 = smov [#allocation13]   ;;  %s1683_s2 = smov [#allocation14]  }
  0x79   :  { %s118_s22 = sshll.u32 %s1682_s21, 4  ;;  %s132_s19 = sshll.u32 %s1683_s2, 4  ;;  %s119_s22 = int_to_ptr.vmem [resolvable:$true] %s118_s22  ;;  %s1897_s19 = int_to_ptr.vmem [resolvable:$true] %s132_s19 }
  0x7a   :  { %s1550_s9 = scalar_lea.hbm %s2088_s11, 1024 }
  0x7b   :  { %p1551_p6 = scmp.ne.s32.totalorder %s2088_s11, %s1550_s9  ;;  %p1554_p7 = scmp.lt.u32.totalorder %s1550_s9, %s2088_s11 }
  0x7d   :  { %p1556_p8 = pnand %p1554_p7, %p1551_p6 }
  0x7f   :  { %1559 = shalt.err (!%p1556_p8)
}
  0x80   :  { %s1560_s7 = scalar_lea.vmem %s119_s22, 1024  ;;  %p1565_p10 = scmp.lt.s32.totalorder %s119_s22, %s119_s22 }
  0x81   :  { %p1561_p9 = scmp.ne.s32.totalorder %s119_s22, %s1560_s7  ;;  %p1566_p11 = scmp.lt.s32.totalorder %s1560_s7, %s1560_s7 }
  0x83   :  { %p1567_p12 = por %p1566_p11, %p1565_p10 }
  0x85   :  { %p1568_p13 = pnand %p1567_p12, %p1561_p9 }
  0x87   :  { %1571 = shalt.err (!%p1568_p13)
}
  0x88   :  { %124 = dma.hbm_to_vmem [thread:$0]  %s2088_s11, 1024, %s119_s22, [#allocation12], %s1676_s25, %s1676_s25, %s1677_s26  }
  0x89   :  { %s1572_s3 = scalar_lea.hbm %s2090_s13, 1024 }
  0x8a   :  { %p1573_p0 = scmp.ne.s32.totalorder %s2090_s13, %s1572_s3  ;;  %p1576_p1 = scmp.lt.u32.totalorder %s1572_s3, %s2090_s13 }
  0x8c   :  { %p1578_p2 = pnand %p1576_p1, %p1573_p0 }
  0x8e   :  { %1581 = shalt.err (!%p1578_p2)
}
  0x8f   :  { %s1582_s23 = scalar_lea.vmem %s1897_s19, 1024  ;;  %p1587_p4 = scmp.lt.s32.totalorder %s1897_s19, %s1897_s19 }
  0x90   :  { %p1583_p3 = scmp.ne.s32.totalorder %s1897_s19, %s1582_s23  ;;  %p1588_p5 = scmp.lt.s32.totalorder %s1582_s23, %s1582_s23 }
  0x92   :  { %p1589_p6 = por %p1588_p5, %p1587_p4 }
  0x94   :  { %p1590_p7 = pnand %p1589_p6, %p1583_p3 }
  0x96   :  { %1593 = shalt.err (!%p1590_p7)
}
  0x97   :  { %138 = dma.hbm_to_vmem [thread:$0]  %s2090_s13, 1024, %s1897_s19, [#allocation15], %s1676_s25, %s1676_s25, %s1677_s26  }
  0x98   :  { %1660 = dma.done.wait [#allocation3], 128  }
  0x99   :  { %1661 = vsyncadd [#allocation3], 4294967168 }
  0x9a   :  { %1662 = dma.done.wait [#allocation6], 2048  }
  0x9b   :  { %1663 = vsyncadd [#allocation6], 4294965248 }
  0x9c   :  { %1664 = dma.done.wait [#allocation9], 2048  }
  0x9d   :  { %1665 = vsyncadd [#allocation9], 4294965248 }
  0x9e   :  { %1666 = dma.done.wait [#allocation12], 2048  }
  0x9f   :  { %1667 = vsyncadd [#allocation12], 4294965248 }
  0xa0   :  { %1668 = dma.done.wait [#allocation15], 1024  }
  0xa1   :  { %1669 = vsyncadd [#allocation15], 4294966272  ;;  %v1684_v0 = vmov 0.0   ;;  %vm1685_vm0 = vmmov 0   ;;  %v1353_v1 = vld [vmem:[#allocation5] sm:$0xff]   ;;  %v1354_v2 = vld [vmem:[#allocation5 + $0x8] sm:$0xff]  }
  0xa2   :  { %1196 = vmatprep.subr.bf16.mxu0 %v1684_v0  ;;  %1212 = vmatprep.mubr.msk.bf16.mxu0 %vm1685_vm0, %v1684_v0  ;;  %v1355_v3 = vld [vmem:[#allocation5 + $0x10] sm:$0xff]   ;;  %v1362_v4 = vld [vmem:[#allocation7] sm:$0xff]   ;;  %v1356_v5 = vld [vmem:[#allocation5 + $0x18] sm:$0xff]   ;;  %s2105_s26 = sld [smem:[#allocation29_spill]]  ;;  %s1686_s28 = smov [#allocation16]  }
  0xa3   :  { %1216 = vmatprep.subr.bf16.mxu1 %v1684_v0  ;;  %1232 = vmatprep.mubr.msk.bf16.mxu1 %vm1685_vm0, %v1684_v0  ;;  %v1363_v6 = vld [vmem:[#allocation7 + $0x8] sm:$0xff]   ;;  %v1357_v7 = vld [vmem:[#allocation5 + $0x20] sm:$0xff]   ;;  %v1364_v8 = vld [vmem:[#allocation7 + $0x10] sm:$0xff]   ;;  %s1021_s27 = sshll.u32 %s1686_s28, 4  ;;  %s1022_s27 = int_to_ptr.vmem [resolvable:$true] %s1021_s27 }
  0xa4   :  { %1197 = vmatpush3.bf16.msra.mxu0 %v1353_v1  ;;  %1217 = vmatpush3.bf16.msra.mxu1 %v1362_v4  ;;  %v1358_v9 = vld [vmem:[#allocation5 + $0x28] sm:$0xff]   ;;  %v1365_v10 = vld [vmem:[#allocation7 + $0x18] sm:$0xff]   ;;  %v1359_v11 = vld [vmem:[#allocation5 + $0x30] sm:$0xff]   ;;  %s1594_s0 = scalar_lea.vmem %s1022_s27, 256  ;;  %p1599_p9 = scmp.lt.s32.totalorder %s1022_s27, %s1022_s27 }
  0xa5   :  { %1198 = vmatprep.subr.bf16.mxu0 %v1684_v0  ;;  %1218 = vmatprep.subr.bf16.mxu1 %v1684_v0  ;;  %v1366_v12 = vld [vmem:[#allocation7 + $0x20] sm:$0xff]   ;;  %v1360_v13 = vld [vmem:[#allocation5 + $0x38] sm:$0xff]   ;;  %v1367_v14 = vld [vmem:[#allocation7 + $0x28] sm:$0xff]   ;;  %p1595_p8 = scmp.ne.s32.totalorder %s1022_s27, %s1594_s0  ;;  %p1600_p10 = scmp.lt.s32.totalorder %s1594_s0, %s1594_s0 }
  0xa6   :  { %v1361_v15 = vld [vmem:[#allocation2] sm:$0xff]   ;;  %v1368_v16 = vld [vmem:[#allocation7 + $0x30] sm:$0xff]   ;;  %v1370_v18 = vld [vmem:[#allocation8] sm:$0xff]  }
  0xa7   :  { %v1369_v17 = vld [vmem:[#allocation7 + $0x38] sm:$0xff]   ;;  %v1371_v19 = vld [vmem:[#allocation8 + $0x8] sm:$0xff]   ;;  %v1372_v20 = vld [vmem:[#allocation8 + $0x10] sm:$0xff]   ;;  %p1601_p11 = por %p1600_p10, %p1599_p9 }
  0xa8   :  { %1199 = vmatpush3.bf16.msra.mxu0 %v1354_v2  ;;  %1219 = vmatpush3.bf16.msra.mxu1 %v1363_v6  ;;  %v1373_v21 = vld [vmem:[#allocation8 + $0x18] sm:$0xff]   ;;  %v1374_v22 = vld [vmem:[#allocation8 + $0x20] sm:$0xff]   ;;  %v1375_v23 = vld [vmem:[#allocation8 + $0x28] sm:$0xff]  }
  0xa9   :  { %1200 = vmatprep.subr.bf16.mxu0 %v1684_v0  ;;  %1220 = vmatprep.subr.bf16.mxu1 %v1684_v0  ;;  %v1068_v24 = vld [vmem:[%s2105_s26] ss:$0 sm:$0xff]  ;;  %v1376_v34 = vld [vmem:[#allocation8 + $0x30] sm:$0xff]   ;;  %v1378_v36 = vld [vmem:[#allocation10] sm:$0xff]   ;;  %p1602_p12 = pnand %p1601_p11, %p1595_p8 }
  0xaa   :  { %v1377_v35 = vld [vmem:[#allocation8 + $0x38] sm:$0xff]   ;;  %v1379_v37 = vld [vmem:[#allocation10 + $0x8] sm:$0xff]   ;;  %v1380_v38 = vld [vmem:[#allocation10 + $0x10] sm:$0xff]  }
  0xab   :  { %v1381_v39 = vld [vmem:[#allocation10 + $0x18] sm:$0xff]   ;;  %v1382_v40 = vld [vmem:[#allocation10 + $0x20] sm:$0xff]   ;;  %v1383_v41 = vld [vmem:[#allocation10 + $0x28] sm:$0xff]  }
  0xac   :  { %1201 = vmatpush3.bf16.msra.mxu0 %v1355_v3  ;;  %1221 = vmatpush3.bf16.msra.mxu1 %v1364_v8  ;;  %v1078_v42 = vld [vmem:[%s2081_s4] ss:$0 sm:$0xff]  ;;  %v1384_v52 = vld [vmem:[#allocation10 + $0x30] sm:$0xff]   ;;  %v1386_v1 = vld [vmem:[#allocation11] sm:$0xff]  }
  0xad   :  { %1202 = vmatprep.subr.bf16.mxu0 %v1684_v0  ;;  %1222 = vmatprep.subr.bf16.mxu1 %v1684_v0  ;;  %v1385_v53 = vld [vmem:[#allocation10 + $0x38] sm:$0xff]   ;;  %v1387_v2 = vld [vmem:[#allocation11 + $0x8] sm:$0xff]   ;;  %v1388_v3 = vld [vmem:[#allocation11 + $0x10] sm:$0xff]  }
  0xae   :  { %v1087_v54 = vld [vmem:[%s2083_s6] ss:$0 sm:$0xff]  ;;  %v1391_v6 = vld [vmem:[#allocation11 + $0x28] sm:$0xff]  }
  0xaf   :  { %v1389_v4 = vld [vmem:[#allocation11 + $0x18] sm:$0xff]  }
  0xb0   :  { %1203 = vmatpush3.bf16.msra.mxu0 %v1356_v5  ;;  %1223 = vmatpush3.bf16.msra.mxu1 %v1365_v10  ;;  %v1390_v5 = vld [vmem:[#allocation11 + $0x20] sm:$0xff]   ;;  %v1393_v8 = vld [vmem:[#allocation11 + $0x38] sm:$0xff]   ;;  %v1403_v10 = vld [vmem:[#allocation13 + $0x8] sm:$0xff]  }
  0xb1   :  { %1204 = vmatprep.subr.bf16.mxu0 %v1684_v0  ;;  %1224 = vmatprep.subr.bf16.mxu1 %v1684_v0 }
  0xb4   :  { %1205 = vmatpush3.bf16.msra.mxu0 %v1357_v7  ;;  %1225 = vmatpush3.bf16.msra.mxu1 %v1366_v12  ;;  %v1392_v7 = vld [vmem:[#allocation11 + $0x30] sm:$0xff]   ;;  %v1405_v12 = vld [vmem:[#allocation13 + $0x18] sm:$0xff]  }
  0xb5   :  { %1206 = vmatprep.subr.bf16.mxu0 %v1684_v0  ;;  %1226 = vmatprep.subr.bf16.mxu1 %v1684_v0 }
  0xb8   :  { %1207 = vmatpush3.bf16.msra.mxu0 %v1358_v9  ;;  %1227 = vmatpush3.bf16.msra.mxu1 %v1367_v14  ;;  %v1402_v9 = vld [vmem:[#allocation13] sm:$0xff]   ;;  %v1407_v14 = vld [vmem:[#allocation13 + $0x28] sm:$0xff]  }
  0xb9   :  { %1208 = vmatprep.subr.bf16.mxu0 %v1684_v0  ;;  %1228 = vmatprep.subr.bf16.mxu1 %v1684_v0 }
  0xbc   :  { %1209 = vmatpush3.bf16.msra.mxu0 %v1359_v11  ;;  %1229 = vmatpush3.bf16.msra.mxu1 %v1368_v16  ;;  %v1404_v11 = vld [vmem:[#allocation13 + $0x10] sm:$0xff]  }
  0xbd   :  { %1210 = vmatprep.subr.bf16.mxu0 %v1684_v0  ;;  %1230 = vmatprep.subr.bf16.mxu1 %v1684_v0 }
  0xc0   :  { %1211 = vmatpush3.bf16.msra.mxu0 %v1360_v13  ;;  %1231 = vmatpush3.bf16.msra.mxu1 %v1369_v17  ;;  %v1406_v13 = vld [vmem:[#allocation13 + $0x20] sm:$0xff]  }
  0xc1   :  { %1236 = vmatprep.subr.bf16.mxu0 %v1684_v0  ;;  %1256 = vmatprep.subr.bf16.mxu1 %v1684_v0 }
  0xc3   :  { %1213 = vmatmul.mubr.bf16.vlgmr.msra.gmra.mrb[0].mxu0 %v1361_v15  ;;  %v1096_v15 = vld [vmem:[%s2085_s8] ss:$0 sm:$0xff] }
  0xc4   :  { %1252 = vmatprep.mubr.msk.bf16.mxu0 %vm1685_vm0, %v1684_v0  ;;  %1237 = vmatpush3.bf16.msra.mxu0 %v1370_v18 }
  0xc5   :  { %1238 = vmatprep.subr.bf16.mxu0 %v1684_v0 }
  0xc8   :  { %1239 = vmatpush3.bf16.msra.mxu0 %v1371_v19 }
  0xc9   :  { %1240 = vmatprep.subr.bf16.mxu0 %v1684_v0 }
  0xcc   :  { %1241 = vmatpush3.bf16.msra.mxu0 %v1372_v20 }
  0xcd   :  { %1242 = vmatprep.subr.bf16.mxu0 %v1684_v0 }
  0xd0   :  { %1243 = vmatpush3.bf16.msra.mxu0 %v1373_v21 }
  0xd1   :  { %1244 = vmatprep.subr.bf16.mxu0 %v1684_v0 }
  0xd4   :  { %1245 = vmatpush3.bf16.msra.mxu0 %v1374_v22 }
  0xd5   :  { %1246 = vmatprep.subr.bf16.mxu0 %v1684_v0 }
  0xd8   :  { %1247 = vmatpush3.bf16.msra.mxu0 %v1375_v23 }
  0xd9   :  { %1248 = vmatprep.subr.bf16.mxu0 %v1684_v0 }
  0xdc   :  { %1249 = vmatpush3.bf16.msra.mxu0 %v1376_v34  ;;  %v1409_v34 = vld [vmem:[#allocation13 + $0x38] sm:$0xff]  }
  0xdd   :  { %1250 = vmatprep.subr.bf16.mxu0 %v1684_v0 }
  0xe0   :  { %1251 = vmatpush3.bf16.msra.mxu0 %v1377_v35  ;;  %v1105_v35 = vld [vmem:[%s2087_s10] ss:$0 sm:$0xff] }
  0xe1   :  { %1276 = vmatprep.subr.bf16.mxu0 %v1684_v0 }
 0x196   :  { %v281_v25 = vpop.f32.mrb[0].mxu0 }
 0x197   :  { %v282_v26 = vadd.f32 %v1068_v24, %v281_v25  ;;  %v1214_v27 = vpop.f32.mrb[1].mxu0 }
 0x198   :  { %v284_v28 = vpop.f32.mrb[2].mxu0  ;;  %v1396_v27 = vld [vmem:[#allocation14 + $0x10] sm:$0xff]  }
 0x199   :  { %v285_v29 = vadd.f32 %v1068_v24, %v284_v28  ;;  %v1215_v30 = vpop.f32.mrb[3].mxu0  ;;  %v288_v31 = vmax.f32 %v282_v26, 0.0  ;;  %v1394_v24 = vld [vmem:[#allocation14] sm:$0xff]   ;;  %v1395_v26 = vld [vmem:[#allocation14 + $0x8] sm:$0xff]   ;;  %v1397_v28 = vld [vmem:[#allocation14 + $0x18] sm:$0xff]  }
 0x19a   :  { %v1399_v30 = vld [vmem:[#allocation14 + $0x28] sm:$0xff]  }
 0x19b   :  { %v289_v32 = vmax.f32 %v285_v29, 0.0  ;;  %v1398_v29 = vld [vmem:[#allocation14 + $0x20] sm:$0xff]  }
 0x19d   :  { %v290_v33 = vpack.c.bf16 %v289_v32, %v288_v31  ;;  %v1400_v31 = vld [vmem:[#allocation14 + $0x30] sm:$0xff]   ;;  %v1401_v32 = vld [vmem:[#allocation14 + $0x38] sm:$0xff]  }
 0x19f   :  { %1233 = vmatmul.mubr.bf16.vlgmr.msra.gmra.mrb[0].mxu1 %v290_v33  ;;  %v1408_v33 = vld [vmem:[#allocation13 + $0x30] sm:$0xff]  }
 0x1a0   :  { %1272 = vmatprep.mubr.msk.bf16.mxu1 %vm1685_vm0, %v1684_v0  ;;  %1257 = vmatpush3.bf16.msra.mxu1 %v1378_v36 }
 0x1a1   :  { %1258 = vmatprep.subr.bf16.mxu1 %v1684_v0 }
 0x1a4   :  { %1259 = vmatpush3.bf16.msra.mxu1 %v1379_v37 }
 0x1a5   :  { %1260 = vmatprep.subr.bf16.mxu1 %v1684_v0 }
 0x1a8   :  { %1261 = vmatpush3.bf16.msra.mxu1 %v1380_v38 }
 0x1a9   :  { %1262 = vmatprep.subr.bf16.mxu1 %v1684_v0 }
 0x1ac   :  { %1263 = vmatpush3.bf16.msra.mxu1 %v1381_v39 }
 0x1ad   :  { %1264 = vmatprep.subr.bf16.mxu1 %v1684_v0 }
 0x1b0   :  { %1265 = vmatpush3.bf16.msra.mxu1 %v1382_v40 }
 0x1b1   :  { %1266 = vmatprep.subr.bf16.mxu1 %v1684_v0 }
 0x1b4   :  { %1267 = vmatpush3.bf16.msra.mxu1 %v1383_v41 }
 0x1b5   :  { %1268 = vmatprep.subr.bf16.mxu1 %v1684_v0 }
 0x1b8   :  { %1269 = vmatpush3.bf16.msra.mxu1 %v1384_v52 }
 0x1b9   :  { %1270 = vmatprep.subr.bf16.mxu1 %v1684_v0 }
 0x1bc   :  { %1271 = vmatpush3.bf16.msra.mxu1 %v1385_v53 }
 0x1bd   :  { %1296 = vmatprep.subr.bf16.mxu1 %v1684_v0 }
 0x272   :  { %v396_v43 = vpop.f32.mrb[0].mxu1 }
 0x273   :  { %v397_v44 = vadd.f32 %v1078_v42, %v396_v43  ;;  %v1234_v45 = vpop.f32.mrb[1].mxu1 }
 0x274   :  { %v399_v46 = vpop.f32.mrb[2].mxu1 }
 0x275   :  { %v400_v47 = vadd.f32 %v1078_v42, %v399_v46  ;;  %v1235_v48 = vpop.f32.mrb[3].mxu1  ;;  %v403_v49 = vmax.f32 %v397_v44, 0.0 }
 0x277   :  { %v404_v50 = vmax.f32 %v400_v47, 0.0 }
 0x279   :  { %v405_v51 = vpack.c.bf16 %v404_v50, %v403_v49 }
 0x27b   :  { %1253 = vmatmul.mubr.bf16.vlgmr.msra.gmra.mrb[4].mxu0 %v405_v51 }
 0x27c   :  { %1292 = vmatprep.mubr.msk.bf16.mxu0 %vm1685_vm0, %v1684_v0  ;;  %1277 = vmatpush3.bf16.msra.mxu0 %v1386_v1 }
 0x27d   :  { %1278 = vmatprep.subr.bf16.mxu0 %v1684_v0 }
 0x280   :  { %1279 = vmatpush3.bf16.msra.mxu0 %v1387_v2 }
 0x281   :  { %1280 = vmatprep.subr.bf16.mxu0 %v1684_v0 }
 0x284   :  { %1281 = vmatpush3.bf16.msra.mxu0 %v1388_v3 }
 0x285   :  { %1282 = vmatprep.subr.bf16.mxu0 %v1684_v0 }
 0x288   :  { %1283 = vmatpush3.bf16.msra.mxu0 %v1389_v4 }
 0x289   :  { %1284 = vmatprep.subr.bf16.mxu0 %v1684_v0 }
 0x28c   :  { %1285 = vmatpush3.bf16.msra.mxu0 %v1390_v5 }
 0x28d   :  { %1286 = vmatprep.subr.bf16.mxu0 %v1684_v0 }
 0x290   :  { %1287 = vmatpush3.bf16.msra.mxu0 %v1391_v6 }
 0x291   :  { %1288 = vmatprep.subr.bf16.mxu0 %v1684_v0 }
 0x294   :  { %1289 = vmatpush3.bf16.msra.mxu0 %v1392_v7 }
 0x295   :  { %1290 = vmatprep.subr.bf16.mxu0 %v1684_v0 }
 0x298   :  { %1291 = vmatpush3.bf16.msra.mxu0 %v1393_v8 }
 0x299   :  { %1316 = vmatprep.subr.bf16.mxu0 %v1684_v0 }
 0x34e   :  { %v511_v55 = vpop.f32.mrb[4].mxu0 }
 0x34f   :  { %v512_v56 = vadd.f32 %v1087_v54, %v511_v55  ;;  %v1254_v57 = vpop.f32.mrb[5].mxu0 }
 0x350   :  { %v514_v58 = vpop.f32.mrb[6].mxu0 }
 0x351   :  { %861 = vst [vmem:[#allocation16] sm:$0xff] %v512_v56  ;;  %v515_v59 = vadd.f32 %v1087_v54, %v514_v58  ;;  %v1255_v60 = vpop.f32.mrb[7].mxu0  ;;  %v865_v61 = vmul.f32 %v512_v56, %v512_v56 }
 0x353   :  { %v1987_v62 = vpack.c.bf16 %v515_v59, %v512_v56  ;;  %862 = vst [vmem:[#allocation16 + $0x8] sm:$0xff] %v515_v59  ;;  %867 = vadd.xlane.f32.xlu0 %v865_v61  ;;  %v866_v63 = vmul.f32 %v515_v59, %v515_v59 }
 0x355   :  { %1273 = vmatmul.mubr.bf16.vlgmr.msra.gmra.mrb[4].mxu1 %v1987_v62 }
 0x356   :  { %1312 = vmatprep.mubr.msk.bf16.mxu1 %vm1685_vm0, %v1684_v0  ;;  %1297 = vmatpush3.bf16.msra.mxu1 %v1402_v9 }
 0x357   :  { %869 = vadd.xlane.f32.xlu0 %v866_v63  ;;  %1298 = vmatprep.subr.bf16.mxu1 %v1684_v0 }
 0x35a   :  { %1299 = vmatpush3.bf16.msra.mxu1 %v1403_v10 }
 0x35b   :  { %1300 = vmatprep.subr.bf16.mxu1 %v1684_v0 }
 0x35e   :  { %1301 = vmatpush3.bf16.msra.mxu1 %v1404_v11 }
 0x35f   :  { %1302 = vmatprep.subr.bf16.mxu1 %v1684_v0 }
 0x362   :  { %1303 = vmatpush3.bf16.msra.mxu1 %v1405_v12 }
 0x363   :  { %1304 = vmatprep.subr.bf16.mxu1 %v1684_v0 }
 0x366   :  { %1305 = vmatpush3.bf16.msra.mxu1 %v1406_v13 }
 0x367   :  { %1306 = vmatprep.subr.bf16.mxu1 %v1684_v0 }
 0x36a   :  { %1307 = vmatpush3.bf16.msra.mxu1 %v1407_v14 }
 0x36b   :  { %1308 = vmatprep.subr.bf16.mxu1 %v1684_v0 }
 0x36e   :  { %1309 = vmatpush3.bf16.msra.mxu1 %v1408_v33 }
 0x36f   :  { %1310 = vmatprep.subr.bf16.mxu1 %v1684_v0 }
 0x372   :  { %1311 = vmatpush3.bf16.msra.mxu1 %v1409_v34 }
 0x3e0   :  { %v868_v45 = vpop.xlane.xlu0 %867 }
 0x3e4   :  { %v870_v46 = vpop.xlane.xlu0 %869 }
 0x428   :  { %v624_v16 = vpop.f32.mrb[4].mxu1 }
 0x429   :  { %v625_v17 = vadd.f32 %v1096_v15, %v624_v16  ;;  %v1274_v18 = vpop.f32.mrb[5].mxu1 }
 0x42a   :  { %v627_v19 = vpop.f32.mrb[6].mxu1 }
 0x42b   :  { %v628_v20 = vadd.f32 %v1096_v15, %v627_v19  ;;  %v1275_v21 = vpop.f32.mrb[7].mxu1  ;;  %v631_v22 = vmax.f32 %v625_v17, 0.0 }
 0x42d   :  { %v632_v23 = vmax.f32 %v628_v20, 0.0 }
 0x42f   :  { %v633_v25 = vpack.c.bf16 %v632_v23, %v631_v22 }
 0x431   :  { %1293 = vmatmul.mubr.bf16.vlgmr.msra.gmra.mrb[8].mxu0 %v633_v25 }
 0x432   :  { %1317 = vmatpush3.bf16.msra.mxu0 %v1394_v24  ;;  %1332 = vmatprep.mubr.msk.bf16.mxu0 %vm1685_vm0, %v1684_v0 }
 0x433   :  { %1318 = vmatprep.subr.bf16.mxu0 %v1684_v0 }
 0x436   :  { %1319 = vmatpush3.bf16.msra.mxu0 %v1395_v26 }
 0x437   :  { %1320 = vmatprep.subr.bf16.mxu0 %v1684_v0 }
 0x43a   :  { %1321 = vmatpush3.bf16.msra.mxu0 %v1396_v27 }
 0x43b   :  { %1322 = vmatprep.subr.bf16.mxu0 %v1684_v0 }
 0x43e   :  { %1323 = vmatpush3.bf16.msra.mxu0 %v1397_v28 }
 0x43f   :  { %1324 = vmatprep.subr.bf16.mxu0 %v1684_v0 }
 0x442   :  { %1325 = vmatpush3.bf16.msra.mxu0 %v1398_v29 }
 0x443   :  { %1326 = vmatprep.subr.bf16.mxu0 %v1684_v0 }
 0x446   :  { %1327 = vmatpush3.bf16.msra.mxu0 %v1399_v30 }
 0x447   :  { %1328 = vmatprep.subr.bf16.mxu0 %v1684_v0 }
 0x44a   :  { %1329 = vmatpush3.bf16.msra.mxu0 %v1400_v31 }
 0x44b   :  { %1330 = vmatprep.subr.bf16.mxu0 %v1684_v0  ;;  %v1131_v0 = vld [vmem:[%s2091_s14] ss:$0 sm:$0xff] }
 0x44c   :  { %v983_v48 = vadd.f32 %v1131_v0, %v868_v45  ;;  %v984_v52 = vadd.f32 %v1131_v0, %v870_v46 }
 0x44e   :  { %1331 = vmatpush3.bf16.msra.mxu0 %v1401_v32 }
 0x451   :  { %1333 = vmatmul.mubr.bf16.vlgmr.msra.gmra.mrb[12].mxu0 %v1987_v62  ;;  %v1132_v62 = vld [vmem:[%s2092_s15] ss:$0 sm:$0xff] }
 0x504   :  { %v739_v36 = vpop.f32.mrb[8].mxu0 }
 0x505   :  { %v740_v37 = vadd.f32 %v1105_v35, %v739_v36  ;;  %v1294_v38 = vpop.f32.mrb[9].mxu0 }
 0x506   :  { %v742_v39 = vpop.f32.mrb[10].mxu0 }
 0x507   :  { %v743_v40 = vadd.f32 %v1105_v35, %v742_v39  ;;  %v1295_v41 = vpop.f32.mrb[11].mxu0  ;;  %v746_v42 = vmax.f32 %v740_v37, 0.0 }
 0x509   :  { %v747_v43 = vmax.f32 %v743_v40, 0.0 }
 0x50b   :  { %v748_v44 = vpack.c.bf16 %v747_v43, %v746_v42 }
 0x50d   :  { %1313 = vmatmul.mubr.bf16.vlgmr.msra.gmra.mrb[8].mxu1 %v748_v44 }
 0x524   :  { %v969_v47 = vpop.f32.mrb[12].mxu0 }
 0x525   :  { %v985_v49 = vmul.f32 2.0, %v969_v47  ;;  %v1334_v50 = vpop.f32.mrb[13].mxu0 }
 0x526   :  { %v972_v51 = vpop.f32.mrb[14].mxu0 }
 0x527   :  { %v987_v53 = vsub.f32 %v983_v48, %v985_v49  ;;  %v986_v54 = vmul.f32 2.0, %v972_v51  ;;  %v1335_v55 = vpop.f32.mrb[15].mxu0 }
 0x529   :  { %v989_v56 = vmax.f32 %v987_v53, 0.0  ;;  %v988_v57 = vsub.f32 %v984_v52, %v986_v54 }
 0x52b   :  { %v991_v58 = vadd.f32 1.0, %v989_v56  ;;  %v990_v59 = vmax.f32 %v988_v57, 0.0 }
 0x52d   :  { %1410 = vrcp.f32 %v991_v58  ;;  %v992_v60 = vadd.f32 1.0, %v990_v59 }
 0x52f   :  { %1412 = vrcp.f32 %v992_v60 }
 0x537   :  { %v1411_v61 = vpop.eup %1410 }
 0x538   :  { %v995_v63 = vmul.f32 %v1411_v61, %v1411_v61 }
 0x539   :  { %v1413_v1 = vpop.eup %1412 }
 0x53a   :  { %v1004_v2 = vmul.f32 %v1132_v62, %v995_v63  ;;  %v996_v3 = vmul.f32 %v1413_v1, %v1413_v1 }
 0x53c   :  { %1006 = vadd.xlane.f32.xlu1 %v1004_v2  ;;  %v1005_v4 = vmul.f32 %v1132_v62, %v996_v3 }
 0x540   :  { %1008 = vadd.xlane.f32.xlu1 %v1005_v4 }
 0x541   :  { %1605 = shalt.err (!%p1602_p12)
}
 0x542   :  { %s1606_s15 = scalar_lea.hbm %s2093_s16, 256 }
 0x543   :  { %p1607_p13 = scmp.ne.s32.totalorder %s2093_s16, %s1606_s15  ;;  %p1610_p0 = scmp.lt.u32.totalorder %s1606_s15, %s2093_s16 }
 0x545   :  { %p1612_p1 = pnand %p1610_p0, %p1607_p13 }
 0x547   :  { %1615 = shalt.err (!%p1612_p1)
}
 0x548   :  { %s1687_s23 = smov 128   ;;  %s1688_s11 = smov 8  }
 0x549   :  { %1027 = dma.vmem_to_hbm [thread:$0]  %s1022_s27, 256, %s2093_s16, [#allocation4], %s1687_s23, %s1687_s23, %s1688_s11  }
 0x54a   :  { %s1689_s25 = smov [#allocation17]  }
 0x54b   :  { %s1033_s26 = sshll.u32 %s1689_s25, 4  ;;  %s1034_s26 = int_to_ptr.vmem [resolvable:$true] %s1033_s26 }
 0x54c   :  { %s1616_s19 = scalar_lea.vmem %s1034_s26, 256  ;;  %p1621_p3 = scmp.lt.s32.totalorder %s1034_s26, %s1034_s26 }
 0x54d   :  { %p1617_p2 = scmp.ne.s32.totalorder %s1034_s26, %s1616_s19  ;;  %p1622_p4 = scmp.lt.s32.totalorder %s1616_s19, %s1616_s19 }
 0x54f   :  { %p1623_p5 = por %p1622_p4, %p1621_p3 }
 0x551   :  { %p1624_p6 = pnand %p1623_p5, %p1617_p2 }
 0x5c9   :  { %v1007_v5 = vpop.xlane.xlu1 %1006 }
 0x5ca   :  { %1414 = vrcp.f32 %v1007_v5 }
 0x5cd   :  { %v1009_v6 = vpop.xlane.xlu1 %1008 }
 0x5ce   :  { %1416 = vrcp.f32 %v1009_v6 }
 0x5d4   :  { %v1415_v7 = vpop.eup %1414 }
 0x5d5   :  { %v1012_v8 = vmul.f32 %v1415_v7, %v1004_v2 }
 0x5d7   :  { %1014 = vst [vmem:[#allocation17] sm:$0xff] %v1012_v8 }
 0x5d8   :  { %v1417_v9 = vpop.eup %1416 }
 0x5d9   :  { %v1013_v10 = vmul.f32 %v1417_v9, %v1005_v4 }
 0x5db   :  { %1015 = vst [vmem:[#allocation17 + $0x8] sm:$0xff] %v1013_v10 }
 0x5dc   :  { %1627 = shalt.err (!%p1624_p6)
}
 0x5dd   :  { %s1628_s4 = scalar_lea.hbm %s2094_s17, 256 }
 0x5de   :  { %p1629_p7 = scmp.ne.s32.totalorder %s2094_s17, %s1628_s4  ;;  %p1632_p8 = scmp.lt.u32.totalorder %s1628_s4, %s2094_s17 }
 0x5e0   :  { %p1634_p9 = pnand %p1632_p8, %p1629_p7 }
 0x5e2   :  { %1637 = shalt.err (!%p1634_p9)
}
 0x5e3   :  { %1039 = dma.vmem_to_hbm [thread:$0]  %s1034_s26, 256, %s2094_s17, [#allocation18], %s1687_s23, %s1687_s23, %s1688_s11   ;;  %v854_v12 = vpop.f32.mrb[8].mxu1 }
 0x5e4   :  { %v1114_v11 = vld [vmem:[%s2089_s12] ss:$0 sm:$0xff]  ;;  %s1690_s14 = smov [#allocation19]   ;;  %v1314_v14 = vpop.f32.mrb[9].mxu1 }
 0x5e5   :  { %s1045_s28 = sshll.u32 %s1690_s14, 4  ;;  %v855_v13 = vadd.f32 %v1114_v11, %v854_v12  ;;  %v857_v15 = vpop.f32.mrb[10].mxu1  ;;  %s1046_s28 = int_to_ptr.vmem [resolvable:$true] %s1045_s28 }
 0x5e6   :  { %v858_v16 = vadd.f32 %v1114_v11, %v857_v15  ;;  %v1315_v17 = vpop.f32.mrb[11].mxu1  ;;  %s1638_s27 = scalar_lea.vmem %s1046_s28, 256  ;;  %p1643_p11 = scmp.lt.s32.totalorder %s1046_s28, %s1046_s28 }
 0x5e7   :  { %863 = vst [vmem:[#allocation19] sm:$0xff] %v855_v13  ;;  %p1639_p10 = scmp.ne.s32.totalorder %s1046_s28, %s1638_s27  ;;  %p1644_p12 = scmp.lt.s32.totalorder %s1638_s27, %s1638_s27 }
 0x5e8   :  { %864 = vst [vmem:[#allocation19 + $0x8] sm:$0xff] %v858_v16 }
 0x5e9   :  { %p1645_p13 = por %p1644_p12, %p1643_p11 }
 0x5eb   :  { %p1646_p0 = pnand %p1645_p13, %p1639_p10 }
 0x5ed   :  { %1649 = shalt.err (!%p1646_p0)
}
 0x5ee   :  { %s2106_s0 = sld [smem:[#allocation30_spill]] }
 0x5f4   :  { %s1650_s20 = scalar_lea.hbm %s2106_s0, 256 }
 0x5f5   :  { %p1651_p1 = scmp.ne.s32.totalorder %s2106_s0, %s1650_s20  ;;  %p1654_p2 = scmp.lt.u32.totalorder %s1650_s20, %s2106_s0 }
 0x5f7   :  { %p1656_p3 = pnand %p1654_p2, %p1651_p1 }
 0x5f9   :  { %1659 = shalt.err (!%p1656_p3)
}
 0x5fa   :  { %1051 = dma.vmem_to_hbm [thread:$0]  %s1046_s28, 256, %s2106_s0, [#allocation18], %s1687_s23, %s1687_s23, %s1688_s11  }
 0x5fb   :  { %1670 = dma.done.wait [#allocation4], 256  }
 0x5fc   :  { %1671 = vsyncadd [#allocation4], 4294967040 }
 0x5fd   :  { %1672 = dma.done.wait [#allocation18], 512  }
 0x5fe   :  { %1673 = vsyncadd [#allocation18], 4294966784 }
 0x5ff   :  { %1061 = vsyncpa [#allocation3], 1 }
 0x600   :  { %1062 = vsyncpa [#allocation6], 1 }
 0x601   :  { %1063 = vsyncpa [#allocation9], 1 }
 0x602   :  { %1064 = vsyncpa [#allocation12], 1 }
 0x603   :  { %1065 = vsyncpa [#allocation15], 1 }
 0x604   :  { %1066 = vsyncpa [#allocation4], 1 }
 0x605   :  { %1067 = vsyncpa [#allocation18], 1 }

// kernel: tpu_custom_call.1
= control target key start
LH: loop header
LB: loop body
LE: loop exit
PB: predicated region body
PF: predicated region fallthrough
CT: control target
= control target key end

     0   :  { %s2077_s0 = inlined_call_operand.hbm [shape: bf16[16,128], index: 0, kind: input, shape index: {}]   ;;  %s2078_s1 = inlined_call_operand.hbm [shape: bf16[128,128], index: 1, kind: input, shape index: {}]   ;;  %s2079_s2 = inlined_call_operand.vmem [shape: f32[1,128], index: 2, kind: input, shape index: {}]   ;;  %s2080_s3 = inlined_call_operand.hbm [shape: bf16[128,128], index: 3, kind: input, shape index: {}]   ;;  %s2081_s4 = inlined_call_operand.vmem [shape: f32[1,128], index: 4, kind: input, shape index: {}]   ;;  %s2082_s5 = inlined_call_operand.hbm [shape: bf16[128,128], index: 5, kind: input, shape index: {}]   ;;  %s2083_s6 = inlined_call_operand.vmem [shape: f32[1,128], index: 6, kind: input, shape index: {}]   ;;  %s2084_s7 = inlined_call_operand.hbm [shape: bf16[128,128], index: 7, kind: input, shape index: {}]   ;;  %s2085_s8 = inlined_call_operand.vmem [shape: f32[1,128], index: 8, kind: input, shape index: {}]   ;;  %s2086_s9 = inlined_call_operand.hbm [shape: bf16[128,128], index: 9, kind: input, shape index: {}]   ;;  %s2087_s10 = inlined_call_operand.vmem [shape: f32[1,128], index: 10, kind: input, shape index: {}]   ;;  %s2088_s11 = inlined_call_operand.hbm [shape: bf16[128,128], index: 11, kind: input, shape index: {}]   ;;  %s2089_s12 = inlined_call_operand.vmem [shape: f32[1,128], index: 12, kind: input, shape index: {}]   ;;  %s2090_s13 = inlined_call_operand.hbm [shape: bf16[128,128], index: 13, kind: input, shape index: {}]   ;;  %s2091_s14 = inlined_call_operand.vmem [shape: f32[1,128], index: 14, kind: input, shape index: {}]   ;;  %s2092_s15 = inlined_call_operand.vmem [shape: f32[1,128], index: 15, kind: input, shape index: {}]   ;;  %s2093_s16 = inlined_call_operand.hbm [shape: f32[16,128], index: 16, kind: output, shape index: {0}]   ;;  %s2094_s17 = inlined_call_operand.hbm [shape: f32[16,128], index: 17, kind: output, shape index: {1}]   ;;  %s2095_s18 = inlined_call_operand.hbm [shape: f32[16,128], index: 18, kind: output, shape index: {2}]  }
   0x1   :  { %2099 = sst [smem:[#allocation27_spill]] %s2077_s0 }
   0x2   :  { %2100 = sst [smem:[#allocation28_spill]] %s2078_s1 }
   0x3   :  { %2101 = sst [smem:[#allocation29_spill]] %s2079_s2 }
   0x4   :  { %2102 = sst [smem:[#allocation30_spill]] %s2095_s18 }
   0x5   :  { %24 = vsyncpa [#allocation3], 0 }
   0x6   :  { %25 = vsyncpa [#allocation6], 0 }
   0x7   :  { %26 = vsyncpa [#allocation9], 0 }
   0x8   :  { %27 = vsyncpa [#allocation12], 0 }
   0x9   :  { %28 = vsyncpa [#allocation15], 0 }
   0xa   :  { %29 = vsyncpa [#allocation4], 0 }
   0xb   :  { %30 = vsyncpa [#allocation18], 0  ;;  %s1674_s27 = smov [#allocation5]   ;;  %s1675_s29 = smov [#allocation8]  }
   0xc   :  { %s48_s28 = sshll.u32 %s1674_s27, 4  ;;  %s76_s30 = sshll.u32 %s1675_s29, 4  ;;  %s49_s28 = int_to_ptr.vmem [resolvable:$true] %s48_s28  ;;  %s1786_s30 = int_to_ptr.vmem [resolvable:$true] %s76_s30 }
   0xd   :  { %s2103_s1 = sld [smem:[#allocation28_spill]] }
  0x13   :  { %s1418_s20 = scalar_lea.hbm %s2103_s1, 1024 }
  0x14   :  { %p1419_p0 = scmp.ne.s32.totalorder %s2103_s1, %s1418_s20  ;;  %p1422_p1 = scmp.lt.u32.totalorder %s1418_s20, %s2103_s1 }
  0x16   :  { %p1424_p2 = pnand %p1422_p1, %p1419_p0 }
  0x18   :  { %1427 = shalt.err (!%p1424_p2)
}
  0x19   :  { %s1428_s24 = scalar_lea.vmem %s49_s28, 1024  ;;  %p1433_p4 = scmp.lt.s32.totalorder %s49_s28, %s49_s28 }
  0x1a   :  { %p1429_p3 = scmp.ne.s32.totalorder %s49_s28, %s1428_s24  ;;  %p1434_p5 = scmp.lt.s32.totalorder %s1428_s24, %s1428_s24 }
  0x1c   :  { %p1435_p6 = por %p1434_p5, %p1433_p4 }
  0x1e   :  { %p1436_p7 = pnand %p1435_p6, %p1429_p3 }
  0x20   :  { %1439 = shalt.err (!%p1436_p7)
}
  0x21   :  { %s1676_s25 = smov 64   ;;  %s1677_s26 = smov 4  }
  0x22   :  { %54 = dma.hbm_to_vmem [thread:$0]  %s2103_s1, 1024, %s49_s28, [#allocation6], %s1676_s25, %s1676_s25, %s1677_s26  }
  0x23   :  { %s1440_s20 = scalar_lea.hbm %s2082_s5, 1024 }
  0x24   :  { %p1441_p8 = scmp.ne.s32.totalorder %s2082_s5, %s1440_s20  ;;  %p1444_p9 = scmp.lt.u32.totalorder %s1440_s20, %s2082_s5 }
  0x26   :  { %p1446_p10 = pnand %p1444_p9, %p1441_p8 }
  0x28   :  { %1449 = shalt.err (!%p1446_p10)
}
  0x29   :  { %s1450_s24 = scalar_lea.vmem %s1786_s30, 1024  ;;  %p1455_p12 = scmp.lt.s32.totalorder %s1786_s30, %s1786_s30 }
  0x2a   :  { %p1451_p11 = scmp.ne.s32.totalorder %s1786_s30, %s1450_s24  ;;  %p1456_p13 = scmp.lt.s32.totalorder %s1450_s24, %s1450_s24 }
  0x2c   :  { %p1457_p0 = por %p1456_p13, %p1455_p12 }
  0x2e   :  { %p1458_p1 = pnand %p1457_p0, %p1451_p11 }
  0x30   :  { %1461 = shalt.err (!%p1458_p1)
}
  0x31   :  { %82 = dma.hbm_to_vmem [thread:$0]  %s2082_s5, 1024, %s1786_s30, [#allocation9], %s1676_s25, %s1676_s25, %s1677_s26  }
  0x32   :  { %s1678_s27 = smov [#allocation11]   ;;  %s1679_s0 = smov [#allocation2]  }
  0x33   :  { %s104_s29 = sshll.u32 %s1678_s27, 4  ;;  %s36_s19 = sshll.u32 %s1679_s0, 4  ;;  %s105_s29 = int_to_ptr.vmem [resolvable:$true] %s104_s29  ;;  %s1823_s19 = int_to_ptr.vmem [resolvable:$true] %s36_s19 }
  0x34   :  { %s1462_s22 = scalar_lea.hbm %s2086_s9, 1024 }
  0x35   :  { %p1463_p2 = scmp.ne.s32.totalorder %s2086_s9, %s1462_s22  ;;  %p1466_p3 = scmp.lt.u32.totalorder %s1462_s22, %s2086_s9 }
  0x37   :  { %p1468_p4 = pnand %p1466_p3, %p1463_p2 }
  0x39   :  { %1471 = shalt.err (!%p1468_p4)
}
  0x3a   :  { %s1472_s5 = scalar_lea.vmem %s105_s29, 1024  ;;  %p1477_p6 = scmp.lt.s32.totalorder %s105_s29, %s105_s29 }
  0x3b   :  { %p1473_p5 = scmp.ne.s32.totalorder %s105_s29, %s1472_s5  ;;  %p1478_p7 = scmp.lt.s32.totalorder %s1472_s5, %s1472_s5 }
  0x3d   :  { %p1479_p8 = por %p1478_p7, %p1477_p6 }
  0x3f   :  { %p1480_p9 = pnand %p1479_p8, %p1473_p5 }
  0x41   :  { %1483 = shalt.err (!%p1480_p9)
}
  0x42   :  { %110 = dma.hbm_to_vmem [thread:$0]  %s2086_s9, 1024, %s105_s29, [#allocation12], %s1676_s25, %s1676_s25, %s1677_s26  }
  0x43   :  { %s2104_s18 = sld [smem:[#allocation27_spill]] }
  0x49   :  { %s1484_s0 = scalar_lea.hbm %s2104_s18, 128 }
  0x4a   :  { %p1485_p10 = scmp.ne.s32.totalorder %s2104_s18, %s1484_s0  ;;  %p1488_p11 = scmp.lt.u32.totalorder %s1484_s0, %s2104_s18 }
  0x4c   :  { %p1490_p12 = pnand %p1488_p11, %p1485_p10 }
  0x4e   :  { %1493 = shalt.err (!%p1490_p12)
}
  0x4f   :  { %s1494_s23 = scalar_lea.vmem %s1823_s19, 128  ;;  %p1499_p0 = scmp.lt.s32.totalorder %s1823_s19, %s1823_s19 }
  0x50   :  { %p1495_p13 = scmp.ne.s32.totalorder %s1823_s19, %s1494_s23  ;;  %p1500_p1 = scmp.lt.s32.totalorder %s1494_s23, %s1494_s23 }
  0x52   :  { %p1501_p2 = por %p1500_p1, %p1499_p0 }
  0x54   :  { %p1502_p3 = pnand %p1501_p2, %p1495_p13 }
  0x56   :  { %1505 = shalt.err (!%p1502_p3)
}
  0x57   :  { %42 = dma.hbm_to_vmem [thread:$0]  %s2104_s18, 128, %s1823_s19, [#allocation3], %s1676_s25, %s1676_s25, %s1677_s26  }
  0x58   :  { %s1680_s24 = smov [#allocation7]   ;;  %s1681_s30 = smov [#allocation10]  }
  0x59   :  { %s62_s5 = sshll.u32 %s1680_s24, 4  ;;  %s90_s28 = sshll.u32 %s1681_s30, 4  ;;  %s63_s5 = int_to_ptr.vmem [resolvable:$true] %s62_s5  ;;  %s1860_s28 = int_to_ptr.vmem [resolvable:$true] %s90_s28 }
  0x5a   :  { %s1506_s0 = scalar_lea.hbm %s2080_s3, 1024 }
  0x5b   :  { %p1507_p4 = scmp.ne.s32.totalorder %s2080_s3, %s1506_s0  ;;  %p1510_p5 = scmp.lt.u32.totalorder %s1506_s0, %s2080_s3 }
  0x5d   :  { %p1512_p6 = pnand %p1510_p5, %p1507_p4 }
  0x5f   :  { %1515 = shalt.err (!%p1512_p6)
}
  0x60   :  { %s1516_s19 = scalar_lea.vmem %s63_s5, 1024  ;;  %p1521_p8 = scmp.lt.s32.totalorder %s63_s5, %s63_s5 }
  0x61   :  { %p1517_p7 = scmp.ne.s32.totalorder %s63_s5, %s1516_s19  ;;  %p1522_p9 = scmp.lt.s32.totalorder %s1516_s19, %s1516_s19 }
  0x63   :  { %p1523_p10 = por %p1522_p9, %p1521_p8 }
  0x65   :  { %p1524_p11 = pnand %p1523_p10, %p1517_p7 }
  0x67   :  { %1527 = shalt.err (!%p1524_p11)
}
  0x68   :  { %68 = dma.hbm_to_vmem [thread:$0]  %s2080_s3, 1024, %s63_s5, [#allocation6], %s1676_s25, %s1676_s25, %s1677_s26  }
  0x69   :  { %s1528_s24 = scalar_lea.hbm %s2084_s7, 1024 }
  0x6a   :  { %p1529_p12 = scmp.ne.s32.totalorder %s2084_s7, %s1528_s24  ;;  %p1532_p13 = scmp.lt.u32.totalorder %s1528_s24, %s2084_s7 }
  0x6c   :  { %p1534_p0 = pnand %p1532_p13, %p1529_p12 }
  0x6e   :  { %1537 = shalt.err (!%p1534_p0)
}
  0x6f   :  { %s1538_s20 = scalar_lea.vmem %s1860_s28, 1024  ;;  %p1543_p2 = scmp.lt.s32.totalorder %s1860_s28, %s1860_s28 }
  0x70   :  { %p1539_p1 = scmp.ne.s32.totalorder %s1860_s28, %s1538_s20  ;;  %p1544_p3 = scmp.lt.s32.totalorder %s1538_s20, %s1538_s20 }
  0x72   :  { %p1545_p4 = por %p1544_p3, %p1543_p2 }
  0x74   :  { %p1546_p5 = pnand %p1545_p4, %p1539_p1 }
  0x76   :  { %1549 = shalt.err (!%p1546_p5)
}
  0x77   :  { %96 = dma.hbm_to_vmem [thread:$0]  %s2084_s7, 1024, %s1860_s28, [#allocation9], %s1676_s25, %s1676_s25, %s1677_s26  }
  0x78   :  { %s1682_s21 = smov [#allocation13]   ;;  %s1683_s2 = smov [#allocation14]  }
  0x79   :  { %s118_s22 = sshll.u32 %s1682_s21, 4  ;;  %s132_s19 = sshll.u32 %s1683_s2, 4  ;;  %s119_s22 = int_to_ptr.vmem [resolvable:$true] %s118_s22  ;;  %s1897_s19 = int_to_ptr.vmem [resolvable:$true] %s132_s19 }
  0x7a   :  { %s1550_s9 = scalar_lea.hbm %s2088_s11, 1024 }
  0x7b   :  { %p1551_p6 = scmp.ne.s32.totalorder %s2088_s11, %s1550_s9  ;;  %p1554_p7 = scmp.lt.u32.totalorder %s1550_s9, %s2088_s11 }
  0x7d   :  { %p1556_p8 = pnand %p1554_p7, %p1551_p6 }
  0x7f   :  { %1559 = shalt.err (!%p1556_p8)
}
  0x80   :  { %s1560_s7 = scalar_lea.vmem %s119_s22, 1024  ;;  %p1565_p10 = scmp.lt.s32.totalorder %s119_s22, %s119_s22 }
  0x81   :  { %p1561_p9 = scmp.ne.s32.totalorder %s119_s22, %s1560_s7  ;;  %p1566_p11 = scmp.lt.s32.totalorder %s1560_s7, %s1560_s7 }
  0x83   :  { %p1567_p12 = por %p1566_p11, %p1565_p10 }
  0x85   :  { %p1568_p13 = pnand %p1567_p12, %p1561_p9 }
  0x87   :  { %1571 = shalt.err (!%p1568_p13)
}
  0x88   :  { %124 = dma.hbm_to_vmem [thread:$0]  %s2088_s11, 1024, %s119_s22, [#allocation12], %s1676_s25, %s1676_s25, %s1677_s26  }
  0x89   :  { %s1572_s3 = scalar_lea.hbm %s2090_s13, 1024 }
  0x8a   :  { %p1573_p0 = scmp.ne.s32.totalorder %s2090_s13, %s1572_s3  ;;  %p1576_p1 = scmp.lt.u32.totalorder %s1572_s3, %s2090_s13 }
  0x8c   :  { %p1578_p2 = pnand %p1576_p1, %p1573_p0 }
  0x8e   :  { %1581 = shalt.err (!%p1578_p2)
}
  0x8f   :  { %s1582_s23 = scalar_lea.vmem %s1897_s19, 1024  ;;  %p1587_p4 = scmp.lt.s32.totalorder %s1897_s19, %s1897_s19 }
  0x90   :  { %p1583_p3 = scmp.ne.s32.totalorder %s1897_s19, %s1582_s23  ;;  %p1588_p5 = scmp.lt.s32.totalorder %s1582_s23, %s1582_s23 }
  0x92   :  { %p1589_p6 = por %p1588_p5, %p1587_p4 }
  0x94   :  { %p1590_p7 = pnand %p1589_p6, %p1583_p3 }
  0x96   :  { %1593 = shalt.err (!%p1590_p7)
}
  0x97   :  { %138 = dma.hbm_to_vmem [thread:$0]  %s2090_s13, 1024, %s1897_s19, [#allocation15], %s1676_s25, %s1676_s25, %s1677_s26  }
  0x98   :  { %1660 = dma.done.wait [#allocation3], 128  }
  0x99   :  { %1661 = vsyncadd [#allocation3], 4294967168 }
  0x9a   :  { %1662 = dma.done.wait [#allocation6], 2048  }
  0x9b   :  { %1663 = vsyncadd [#allocation6], 4294965248 }
  0x9c   :  { %1664 = dma.done.wait [#allocation9], 2048  }
  0x9d   :  { %1665 = vsyncadd [#allocation9], 4294965248 }
  0x9e   :  { %1666 = dma.done.wait [#allocation12], 2048  }
  0x9f   :  { %1667 = vsyncadd [#allocation12], 4294965248 }
  0xa0   :  { %1668 = dma.done.wait [#allocation15], 1024  }
  0xa1   :  { %1669 = vsyncadd [#allocation15], 4294966272  ;;  %v1684_v0 = vmov 0.0   ;;  %vm1685_vm0 = vmmov 0   ;;  %v1353_v1 = vld [vmem:[#allocation5] sm:$0xff]   ;;  %v1354_v2 = vld [vmem:[#allocation5 + $0x8] sm:$0xff]  }
  0xa2   :  { %1196 = vmatprep.subr.bf16.mxu0 %v1684_v0  ;;  %1212 = vmatprep.mubr.msk.bf16.mxu0 %vm1685_vm0, %v1684_v0  ;;  %v1355_v3 = vld [vmem:[#allocation5 + $0x10] sm:$0xff]   ;;  %v1362_v4 = vld [vmem:[#allocation7] sm:$0xff]   ;;  %v1356_v5 = vld [vmem:[#allocation5 + $0x18] sm:$0xff]   ;;  %s2105_s26 = sld [smem:[#allocation29_spill]]  ;;  %s1686_s28 = smov [#allocation16]  }
  0xa3   :  { %1216 = vmatprep.subr.bf16.mxu1 %v1684_v0  ;;  %1232 = vmatprep.mubr.msk.bf16.mxu1 %vm1685_vm0, %v1684_v0  ;;  %v1363_v6 = vld [vmem:[#allocation7 + $0x8] sm:$0xff]   ;;  %v1357_v7 = vld [vmem:[#allocation5 + $0x20] sm:$0xff]   ;;  %v1364_v8 = vld [vmem:[#allocation7 + $0x10] sm:$0xff]   ;;  %s1021_s27 = sshll.u32 %s1686_s28, 4  ;;  %s1022_s27 = int_to_ptr.vmem [resolvable:$true] %s1021_s27 }
  0xa4   :  { %1197 = vmatpush3.bf16.msra.mxu0 %v1353_v1  ;;  %1217 = vmatpush3.bf16.msra.mxu1 %v1362_v4  ;;  %v1358_v9 = vld [vmem:[#allocation5 + $0x28] sm:$0xff]   ;;  %v1365_v10 = vld [vmem:[#allocation7 + $0x18] sm:$0xff]   ;;  %v1359_v11 = vld [vmem:[#allocation5 + $0x30] sm:$0xff]   ;;  %s1594_s0 = scalar_lea.vmem %s1022_s27, 256  ;;  %p1599_p9 = scmp.lt.s32.totalorder %s1022_s27, %s1022_s27 }
  0xa5   :  { %1198 = vmatprep.subr.bf16.mxu0 %v1684_v0  ;;  %1218 = vmatprep.subr.bf16.mxu1 %v1684_v0  ;;  %v1366_v12 = vld [vmem:[#allocation7 + $0x20] sm:$0xff]   ;;  %v1360_v13 = vld [vmem:[#allocation5 + $0x38] sm:$0xff]   ;;  %v1367_v14 = vld [vmem:[#allocation7 + $0x28] sm:$0xff]   ;;  %p1595_p8 = scmp.ne.s32.totalorder %s1022_s27, %s1594_s0  ;;  %p1600_p10 = scmp.lt.s32.totalorder %s1594_s0, %s1594_s0 }
  0xa6   :  { %v1361_v15 = vld [vmem:[#allocation2] sm:$0xff]   ;;  %v1368_v16 = vld [vmem:[#allocation7 + $0x30] sm:$0xff]   ;;  %v1370_v18 = vld [vmem:[#allocation8] sm:$0xff]  }
  0xa7   :  { %v1369_v17 = vld [vmem:[#allocation7 + $0x38] sm:$0xff]   ;;  %v1371_v19 = vld [vmem:[#allocation8 + $0x8] sm:$0xff]   ;;  %v1372_v20 = vld [vmem:[#allocation8 + $0x10] sm:$0xff]   ;;  %p1601_p11 = por %p1600_p10, %p1599_p9 }
  0xa8   :  { %1199 = vmatpush3.bf16.msra.mxu0 %v1354_v2  ;;  %1219 = vmatpush3.bf16.msra.mxu1 %v1363_v6  ;;  %v1373_v21 = vld [vmem:[#allocation8 + $0x18] sm:$0xff]   ;;  %v1374_v22 = vld [vmem:[#allocation8 + $0x20] sm:$0xff]   ;;  %v1375_v23 = vld [vmem:[#allocation8 + $0x28] sm:$0xff]  }
  0xa9   :  { %1200 = vmatprep.subr.bf16.mxu0 %v1684_v0  ;;  %1220 = vmatprep.subr.bf16.mxu1 %v1684_v0  ;;  %v1068_v24 = vld [vmem:[%s2105_s26] ss:$0 sm:$0xff]  ;;  %v1376_v34 = vld [vmem:[#allocation8 + $0x30] sm:$0xff]   ;;  %v1378_v36 = vld [vmem:[#allocation10] sm:$0xff]   ;;  %p1602_p12 = pnand %p1601_p11, %p1595_p8 }
  0xaa   :  { %v1377_v35 = vld [vmem:[#allocation8 + $0x38] sm:$0xff]   ;;  %v1379_v37 = vld [vmem:[#allocation10 + $0x8] sm:$0xff]   ;;  %v1380_v38 = vld [vmem:[#allocation10 + $0x10] sm:$0xff]  }
  0xab   :  { %v1381_v39 = vld [vmem:[#allocation10 + $0x18] sm:$0xff]   ;;  %v1382_v40 = vld [vmem:[#allocation10 + $0x20] sm:$0xff]   ;;  %v1383_v41 = vld [vmem:[#allocation10 + $0x28] sm:$0xff]  }
  0xac   :  { %1201 = vmatpush3.bf16.msra.mxu0 %v1355_v3  ;;  %1221 = vmatpush3.bf16.msra.mxu1 %v1364_v8  ;;  %v1078_v42 = vld [vmem:[%s2081_s4] ss:$0 sm:$0xff]  ;;  %v1384_v52 = vld [vmem:[#allocation10 + $0x30] sm:$0xff]   ;;  %v1386_v1 = vld [vmem:[#allocation11] sm:$0xff]  }
  0xad   :  { %1202 = vmatprep.subr.bf16.mxu0 %v1684_v0  ;;  %1222 = vmatprep.subr.bf16.mxu1 %v1684_v0  ;;  %v1385_v53 = vld [vmem:[#allocation10 + $0x38] sm:$0xff]   ;;  %v1387_v2 = vld [vmem:[#allocation11 + $0x8] sm:$0xff]   ;;  %v1388_v3 = vld [vmem:[#allocation11 + $0x10] sm:$0xff]  }
  0xae   :  { %v1087_v54 = vld [vmem:[%s2083_s6] ss:$0 sm:$0xff]  ;;  %v1391_v6 = vld [vmem:[#allocation11 + $0x28] sm:$0xff]  }
  0xaf   :  { %v1389_v4 = vld [vmem:[#allocation11 + $0x18] sm:$0xff]  }
  0xb0   :  { %1203 = vmatpush3.bf16.msra.mxu0 %v1356_v5  ;;  %1223 = vmatpush3.bf16.msra.mxu1 %v1365_v10  ;;  %v1390_v5 = vld [vmem:[#allocation11 + $0x20] sm:$0xff]   ;;  %v1393_v8 = vld [vmem:[#allocation11 + $0x38] sm:$0xff]   ;;  %v1403_v10 = vld [vmem:[#allocation13 + $0x8] sm:$0xff]  }
  0xb1   :  { %1204 = vmatprep.subr.bf16.mxu0 %v1684_v0  ;;  %1224 = vmatprep.subr.bf16.mxu1 %v1684_v0 }
  0xb4   :  { %1205 = vmatpush3.bf16.msra.mxu0 %v1357_v7  ;;  %1225 = vmatpush3.bf16.msra.mxu1 %v1366_v12  ;;  %v1392_v7 = vld [vmem:[#allocation11 + $0x30] sm:$0xff]   ;;  %v1405_v12 = vld [vmem:[#allocation13 + $0x18] sm:$0xff]  }
  0xb5   :  { %1206 = vmatprep.subr.bf16.mxu0 %v1684_v0  ;;  %1226 = vmatprep.subr.bf16.mxu1 %v1684_v0 }
  0xb8   :  { %1207 = vmatpush3.bf16.msra.mxu0 %v1358_v9  ;;  %1227 = vmatpush3.bf16.msra.mxu1 %v1367_v14  ;;  %v1402_v9 = vld [vmem:[#allocation13] sm:$0xff]   ;;  %v1407_v14 = vld [vmem:[#allocation13 + $0x28] sm:$0xff]  }
  0xb9   :  { %1208 = vmatprep.subr.bf16.mxu0 %v1684_v0  ;;  %1228 = vmatprep.subr.bf16.mxu1 %v1684_v0 }
  0xbc   :  { %1209 = vmatpush3.bf16.msra.mxu0 %v1359_v11  ;;  %1229 = vmatpush3.bf16.msra.mxu1 %v1368_v16  ;;  %v1404_v11 = vld [vmem:[#allocation13 + $0x10] sm:$0xff]  }
  0xbd   :  { %1210 = vmatprep.subr.bf16.mxu0 %v1684_v0  ;;  %1230 = vmatprep.subr.bf16.mxu1 %v1684_v0 }
  0xc0   :  { %1211 = vmatpush3.bf16.msra.mxu0 %v1360_v13  ;;  %1231 = vmatpush3.bf16.msra.mxu1 %v1369_v17  ;;  %v1406_v13 = vld [vmem:[#allocation13 + $0x20] sm:$0xff]  }
  0xc1   :  { %1236 = vmatprep.subr.bf16.mxu0 %v1684_v0  ;;  %1256 = vmatprep.subr.bf16.mxu1 %v1684_v0 }
  0xc3   :  { %1213 = vmatmul.mubr.bf16.vlgmr.msra.gmra.mrb[0].mxu0 %v1361_v15  ;;  %v1096_v15 = vld [vmem:[%s2085_s8] ss:$0 sm:$0xff] }
  0xc4   :  { %1252 = vmatprep.mubr.msk.bf16.mxu0 %vm1685_vm0, %v1684_v0  ;;  %1237 = vmatpush3.bf16.msra.mxu0 %v1370_v18 }
  0xc5   :  { %1238 = vmatprep.subr.bf16.mxu0 %v1684_v0 }
  0xc8   :  { %1239 = vmatpush3.bf16.msra.mxu0 %v1371_v19 }
  0xc9   :  { %1240 = vmatprep.subr.bf16.mxu0 %v1684_v0 }
  0xcc   :  { %1241 = vmatpush3.bf16.msra.mxu0 %v1372_v20 }
  0xcd   :  { %1242 = vmatprep.subr.bf16.mxu0 %v1684_v0 }
  0xd0   :  { %1243 = vmatpush3.bf16.msra.mxu0 %v1373_v21 }
  0xd1   :  { %1244 = vmatprep.subr.bf16.mxu0 %v1684_v0 }
  0xd4   :  { %1245 = vmatpush3.bf16.msra.mxu0 %v1374_v22 }
  0xd5   :  { %1246 = vmatprep.subr.bf16.mxu0 %v1684_v0 }
  0xd8   :  { %1247 = vmatpush3.bf16.msra.mxu0 %v1375_v23 }
  0xd9   :  { %1248 = vmatprep.subr.bf16.mxu0 %v1684_v0 }
  0xdc   :  { %1249 = vmatpush3.bf16.msra.mxu0 %v1376_v34  ;;  %v1409_v34 = vld [vmem:[#allocation13 + $0x38] sm:$0xff]  }
  0xdd   :  { %1250 = vmatprep.subr.bf16.mxu0 %v1684_v0 }
  0xe0   :  { %1251 = vmatpush3.bf16.msra.mxu0 %v1377_v35  ;;  %v1105_v35 = vld [vmem:[%s2087_s10] ss:$0 sm:$0xff] }
  0xe1   :  { %1276 = vmatprep.subr.bf16.mxu0 %v1684_v0 }
 0x196   :  { %v281_v25 = vpop.f32.mrb[0].mxu0 }
 0x197   :  { %v282_v26 = vadd.f32 %v1068_v24, %v281_v25  ;;  %v1214_v27 = vpop.f32.mrb[1].mxu0 }
 0x198   :  { %v284_v28 = vpop.f32.mrb[2].mxu0  ;;  %v1396_v27 = vld [vmem:[#allocation14 + $0x10] sm:$0xff]  }
 0x199   :  { %v285_v29 = vadd.f32 %v1068_v24, %v284_v28  ;;  %v1215_v30 = vpop.f32.mrb[3].mxu0  ;;  %v288_v31 = vmax.f32 %v282_v26, 0.0  ;;  %v1394_v24 = vld [vmem:[#allocation14] sm:$0xff]   ;;  %v1395_v26 = vld [vmem:[#allocation14 + $0x8] sm:$0xff]   ;;  %v1397_v28 = vld [vmem:[#allocation14 + $0x18] sm:$0xff]  }
 0x19a   :  { %v1399_v30 = vld [vmem:[#allocation14 + $0x28] sm:$0xff]  }
 0x19b   :  { %v289_v32 = vmax.f32 %v285_v29, 0.0  ;;  %v1398_v29 = vld [vmem:[#allocation14 + $0x20] sm:$0xff]  }
 0x19d   :  { %v290_v33 = vpack.c.bf16 %v289_v32, %v288_v31  ;;  %v1400_v31 = vld [vmem:[#allocation14 + $0x30] sm:$0xff]   ;;  %v1401_v32 = vld [vmem:[#allocation14 + $0x38] sm:$0xff]  }
 0x19f   :  { %1233 = vmatmul.mubr.bf16.vlgmr.msra.gmra.mrb[0].mxu1 %v290_v33  ;;  %v1408_v33 = vld [vmem:[#allocation13 + $0x30] sm:$0xff]  }
 0x1a0   :  { %1272 = vmatprep.mubr.msk.bf16.mxu1 %vm1685_vm0, %v1684_v0  ;;  %1257 = vmatpush3.bf16.msra.mxu1 %v1378_v36 }
 0x1a1   :  { %1258 = vmatprep.subr.bf16.mxu1 %v1684_v0 }
 0x1a4   :  { %1259 = vmatpush3.bf16.msra.mxu1 %v1379_v37 }
 0x1a5   :  { %1260 = vmatprep.subr.bf16.mxu1 %v1684_v0 }
 0x1a8   :  { %1261 = vmatpush3.bf16.msra.mxu1 %v1380_v38 }
 0x1a9   :  { %1262 = vmatprep.subr.bf16.mxu1 %v1684_v0 }
 0x1ac   :  { %1263 = vmatpush3.bf16.msra.mxu1 %v1381_v39 }
 0x1ad   :  { %1264 = vmatprep.subr.bf16.mxu1 %v1684_v0 }
 0x1b0   :  { %1265 = vmatpush3.bf16.msra.mxu1 %v1382_v40 }
 0x1b1   :  { %1266 = vmatprep.subr.bf16.mxu1 %v1684_v0 }
 0x1b4   :  { %1267 = vmatpush3.bf16.msra.mxu1 %v1383_v41 }
 0x1b5   :  { %1268 = vmatprep.subr.bf16.mxu1 %v1684_v0 }
 0x1b8   :  { %1269 = vmatpush3.bf16.msra.mxu1 %v1384_v52 }
 0x1b9   :  { %1270 = vmatprep.subr.bf16.mxu1 %v1684_v0 }
 0x1bc   :  { %1271 = vmatpush3.bf16.msra.mxu1 %v1385_v53 }
 0x1bd   :  { %1296 = vmatprep.subr.bf16.mxu1 %v1684_v0 }
 0x272   :  { %v396_v43 = vpop.f32.mrb[0].mxu1 }
 0x273   :  { %v397_v44 = vadd.f32 %v1078_v42, %v396_v43  ;;  %v1234_v45 = vpop.f32.mrb[1].mxu1 }
 0x274   :  { %v399_v46 = vpop.f32.mrb[2].mxu1 }
 0x275   :  { %v400_v47 = vadd.f32 %v1078_v42, %v399_v46  ;;  %v1235_v48 = vpop.f32.mrb[3].mxu1  ;;  %v403_v49 = vmax.f32 %v397_v44, 0.0 }
 0x277   :  { %v404_v50 = vmax.f32 %v400_v47, 0.0 }
 0x279   :  { %v405_v51 = vpack.c.bf16 %v404_v50, %v403_v49 }
 0x27b   :  { %1253 = vmatmul.mubr.bf16.vlgmr.msra.gmra.mrb[4].mxu0 %v405_v51 }
 0x27c   :  { %1292 = vmatprep.mubr.msk.bf16.mxu0 %vm1685_vm0, %v1684_v0  ;;  %1277 = vmatpush3.bf16.msra.mxu0 %v1386_v1 }
 0x27d   :  { %1278 = vmatprep.subr.bf16.mxu0 %v1684_v0 }
 0x280   :  { %1279 = vmatpush3.bf16.msra.mxu0 %v1387_v2 }
 0x281   :  { %1280 = vmatprep.subr.bf16.mxu0 %v1684_v0 }
 0x284   :  { %1281 = vmatpush3.bf16.msra.mxu0 %v1388_v3 }
 0x285   :  { %1282 = vmatprep.subr.bf16.mxu0 %v1684_v0 }
 0x288   :  { %1283 = vmatpush3.bf16.msra.mxu0 %v1389_v4 }
 0x289   :  { %1284 = vmatprep.subr.bf16.mxu0 %v1684_v0 }
 0x28c   :  { %1285 = vmatpush3.bf16.msra.mxu0 %v1390_v5 }
 0x28d   :  { %1286 = vmatprep.subr.bf16.mxu0 %v1684_v0 }
 0x290   :  { %1287 = vmatpush3.bf16.msra.mxu0 %v1391_v6 }
 0x291   :  { %1288 = vmatprep.subr.bf16.mxu0 %v1684_v0 }
 0x294   :  { %1289 = vmatpush3.bf16.msra.mxu0 %v1392_v7 }
 0x295   :  { %1290 = vmatprep.subr.bf16.mxu0 %v1684_v0 }
 0x298   :  { %1291 = vmatpush3.bf16.msra.mxu0 %v1393_v8 }
 0x299   :  { %1316 = vmatprep.subr.bf16.mxu0 %v1684_v0 }
 0x34e   :  { %v511_v55 = vpop.f32.mrb[4].mxu0 }
 0x34f   :  { %v512_v56 = vadd.f32 %v1087_v54, %v511_v55  ;;  %v1254_v57 = vpop.f32.mrb[5].mxu0 }
 0x350   :  { %v514_v58 = vpop.f32.mrb[6].mxu0 }
 0x351   :  { %861 = vst [vmem:[#allocation16] sm:$0xff] %v512_v56  ;;  %v515_v59 = vadd.f32 %v1087_v54, %v514_v58  ;;  %v1255_v60 = vpop.f32.mrb[7].mxu0  ;;  %v865_v61 = vmul.f32 %v512_v56, %v512_v56 }
 0x353   :  { %v1987_v62 = vpack.c.bf16 %v515_v59, %v512_v56  ;;  %862 = vst [vmem:[#allocation16 + $0x8] sm:$0xff] %v515_v59  ;;  %867 = vadd.xlane.f32.xlu0 %v865_v61  ;;  %v866_v63 = vmul.f32 %v515_v59, %v515_v59 }
 0x355   :  { %1273 = vmatmul.mubr.bf16.vlgmr.msra.gmra.mrb[4].mxu1 %v1987_v62 }
 0x356   :  { %1312 = vmatprep.mubr.msk.bf16.mxu1 %vm1685_vm0, %v1684_v0  ;;  %1297 = vmatpush3.bf16.msra.mxu1 %v1402_v9 }
 0x357   :  { %869 = vadd.xlane.f32.xlu0 %v866_v63  ;;  %1298 = vmatprep.subr.bf16.mxu1 %v1684_v0 }
 0x35a   :  { %1299 = vmatpush3.bf16.msra.mxu1 %v1403_v10 }
 0x35b   :  { %1300 = vmatprep.subr.bf16.mxu1 %v1684_v0 }
 0x35e   :  { %1301 = vmatpush3.bf16.msra.mxu1 %v1404_v11 }
 0x35f   :  { %1302 = vmatprep.subr.bf16.mxu1 %v1684_v0 }
 0x362   :  { %1303 = vmatpush3.bf16.msra.mxu1 %v1405_v12 }
 0x363   :  { %1304 = vmatprep.subr.bf16.mxu1 %v1684_v0 }
 0x366   :  { %1305 = vmatpush3.bf16.msra.mxu1 %v1406_v13 }
 0x367   :  { %1306 = vmatprep.subr.bf16.mxu1 %v1684_v0 }
 0x36a   :  { %1307 = vmatpush3.bf16.msra.mxu1 %v1407_v14 }
 0x36b   :  { %1308 = vmatprep.subr.bf16.mxu1 %v1684_v0 }
 0x36e   :  { %1309 = vmatpush3.bf16.msra.mxu1 %v1408_v33 }
 0x36f   :  { %1310 = vmatprep.subr.bf16.mxu1 %v1684_v0 }
 0x372   :  { %1311 = vmatpush3.bf16.msra.mxu1 %v1409_v34 }
 0x3e0   :  { %v868_v45 = vpop.xlane.xlu0 %867 }
 0x3e4   :  { %v870_v46 = vpop.xlane.xlu0 %869 }
 0x428   :  { %v624_v16 = vpop.f32.mrb[4].mxu1 }
 0x429   :  { %v625_v17 = vadd.f32 %v1096_v15, %v624_v16  ;;  %v1274_v18 = vpop.f32.mrb[5].mxu1 }
 0x42a   :  { %v627_v19 = vpop.f32.mrb[6].mxu1 }
 0x42b   :  { %v628_v20 = vadd.f32 %v1096_v15, %v627_v19  ;;  %v1275_v21 = vpop.f32.mrb[7].mxu1  ;;  %v631_v22 = vmax.f32 %v625_v17, 0.0 }
 0x42d   :  { %v632_v23 = vmax.f32 %v628_v20, 0.0 }
 0x42f   :  { %v633_v25 = vpack.c.bf16 %v632_v23, %v631_v22 }
 0x431   :  { %1293 = vmatmul.mubr.bf16.vlgmr.msra.gmra.mrb[8].mxu0 %v633_v25 }
 0x432   :  { %1317 = vmatpush3.bf16.msra.mxu0 %v1394_v24  ;;  %1332 = vmatprep.mubr.msk.bf16.mxu0 %vm1685_vm0, %v1684_v0 }
 0x433   :  { %1318 = vmatprep.subr.bf16.mxu0 %v1684_v0 }
 0x436   :  { %1319 = vmatpush3.bf16.msra.mxu0 %v1395_v26 }
 0x437   :  { %1320 = vmatprep.subr.bf16.mxu0 %v1684_v0 }
 0x43a   :  { %1321 = vmatpush3.bf16.msra.mxu0 %v1396_v27 }
 0x43b   :  { %1322 = vmatprep.subr.bf16.mxu0 %v1684_v0 }
 0x43e   :  { %1323 = vmatpush3.bf16.msra.mxu0 %v1397_v28 }
 0x43f   :  { %1324 = vmatprep.subr.bf16.mxu0 %v1684_v0 }
 0x442   :  { %1325 = vmatpush3.bf16.msra.mxu0 %v1398_v29 }
 0x443   :  { %1326 = vmatprep.subr.bf16.mxu0 %v1684_v0 }
 0x446   :  { %1327 = vmatpush3.bf16.msra.mxu0 %v1399_v30 }
 0x447   :  { %1328 = vmatprep.subr.bf16.mxu0 %v1684_v0 }
 0x44a   :  { %1329 = vmatpush3.bf16.msra.mxu0 %v1400_v31 }
 0x44b   :  { %1330 = vmatprep.subr.bf16.mxu0 %v1684_v0  ;;  %v1131_v0 = vld [vmem:[%s2091_s14] ss:$0 sm:$0xff] }
 0x44c   :  { %v983_v48 = vadd.f32 %v1131_v0, %v868_v45  ;;  %v984_v52 = vadd.f32 %v1131_v0, %v870_v46 }
 0x44e   :  { %1331 = vmatpush3.bf16.msra.mxu0 %v1401_v32 }
 0x451   :  { %1333 = vmatmul.mubr.bf16.vlgmr.msra.gmra.mrb[12].mxu0 %v1987_v62  ;;  %v1132_v62 = vld [vmem:[%s2092_s15] ss:$0 sm:$0xff] }
 0x504   :  { %v739_v36 = vpop.f32.mrb[8].mxu0 }
 0x505   :  { %v740_v37 = vadd.f32 %v1105_v35, %v739_v36  ;;  %v1294_v38 = vpop.f32.mrb[9].mxu0 }
 0x506   :  { %v742_v39 = vpop.f32.mrb[10].mxu0 }
 0x507   :  { %v743_v40 = vadd.f32 %v1105_v35, %v742_v39  ;;  %v1295_v41 = vpop.f32.mrb[11].mxu0  ;;  %v746_v42 = vmax.f32 %v740_v37, 0.0 }
 0x509   :  { %v747_v43 = vmax.f32 %v743_v40, 0.0 }
 0x50b   :  { %v748_v44 = vpack.c.bf16 %v747_v43, %v746_v42 }
 0x50d   :  { %1313 = vmatmul.mubr.bf16.vlgmr.msra.gmra.mrb[8].mxu1 %v748_v44 }
 0x524   :  { %v969_v47 = vpop.f32.mrb[12].mxu0 }
 0x525   :  { %v985_v49 = vmul.f32 2.0, %v969_v47  ;;  %v1334_v50 = vpop.f32.mrb[13].mxu0 }
 0x526   :  { %v972_v51 = vpop.f32.mrb[14].mxu0 }
 0x527   :  { %v987_v53 = vsub.f32 %v983_v48, %v985_v49  ;;  %v986_v54 = vmul.f32 2.0, %v972_v51  ;;  %v1335_v55 = vpop.f32.mrb[15].mxu0 }
 0x529   :  { %v989_v56 = vmax.f32 %v987_v53, 0.0  ;;  %v988_v57 = vsub.f32 %v984_v52, %v986_v54 }
 0x52b   :  { %v991_v58 = vadd.f32 1.0, %v989_v56  ;;  %v990_v59 = vmax.f32 %v988_v57, 0.0 }
 0x52d   :  { %1410 = vrcp.f32 %v991_v58  ;;  %v992_v60 = vadd.f32 1.0, %v990_v59 }
 0x52f   :  { %1412 = vrcp.f32 %v992_v60 }
 0x537   :  { %v1411_v61 = vpop.eup %1410 }
 0x538   :  { %v995_v63 = vmul.f32 %v1411_v61, %v1411_v61 }
 0x539   :  { %v1413_v1 = vpop.eup %1412 }
 0x53a   :  { %v1004_v2 = vmul.f32 %v1132_v62, %v995_v63  ;;  %v996_v3 = vmul.f32 %v1413_v1, %v1413_v1 }
 0x53c   :  { %1006 = vadd.xlane.f32.xlu1 %v1004_v2  ;;  %v1005_v4 = vmul.f32 %v1132_v62, %v996_v3 }
 0x540   :  { %1008 = vadd.xlane.f32.xlu1 %v1005_v4 }
 0x541   :  { %1605 = shalt.err (!%p1602_p12)
}
 0x542   :  { %s1606_s15 = scalar_lea.hbm %s2093_s16, 256 }
 0x543   :  { %p1607_p13 = scmp.ne.s32.totalorder %s2093_s16, %s1606_s15  ;;  %p1610_p0 = scmp.lt.u32.totalorder %s1606_s15, %s2093_s16 }
 0x545   :  { %p1612_p1 = pnand %p1610_p0, %p1607_p13 }
 0x547   :  { %1615 = shalt.err (!%p1612_p1)
}
 0x548   :  { %s1687_s23 = smov 128   ;;  %s1688_s11 = smov 8  }
 0x549   :  { %1027 = dma.vmem_to_hbm [thread:$0]  %s1022_s27, 256, %s2093_s16, [#allocation4], %s1687_s23, %s1687_s23, %s1688_s11  }
 0x54a   :  { %s1689_s25 = smov [#allocation17]  }
 0x54b   :  { %s1033_s26 = sshll.u32 %s1689_s25, 4  ;;  %s1034_s26 = int_to_ptr.vmem [resolvable:$true] %s1033_s26 }
 0x54c   :  { %s1616_s19 = scalar_lea.vmem %s1034_s26, 256  ;;  %p1621_p3 = scmp.lt.s32.totalorder %s1034_s26, %s1034_s26 }
 0x54d   :  { %p1617_p2 = scmp.ne.s32.totalorder %s1034_s26, %s1616_s19  ;;  %p1622_p4 = scmp.lt.s32.totalorder %s1616_s19, %s1616_s19 }
 0x54f   :  { %p1623_p5 = por %p1622_p4, %p1621_p3 }
 0x551   :  { %p1624_p6 = pnand %p1623_p5, %p1617_p2 }
 0x5c9   :  { %v1007_v5 = vpop.xlane.xlu1 %1006 }
 0x5ca   :  { %1414 = vrcp.f32 %v1007_v5 }
 0x5cd   :  { %v1009_v6 = vpop.xlane.xlu1 %1008 }
 0x5ce   :  { %1416 = vrcp.f32 %v1009_v6 }
 0x5d4   :  { %v1415_v7 = vpop.eup %1414 }
 0x5d5   :  { %v1012_v8 = vmul.f32 %v1415_v7, %v1004_v2 }
 0x5d7   :  { %1014 = vst [vmem:[#allocation17] sm:$0xff] %v1012_v8 }
 0x5d8   :  { %v1417_v9 = vpop.eup %1416 }
 0x5d9   :  { %v1013_v10 = vmul.f32 %v1417_v9, %v1005_v4 }
 0x5db   :  { %1015 = vst [vmem:[#allocation17 + $0x8] sm:$0xff] %v1013_v10 }
 0x5dc   :  { %1627 = shalt.err (!%p1624_p6)
}
 0x5dd   :  { %s1628_s4 = scalar_lea.hbm %s2094_s17, 256 }
 0x5de   :  { %p1629_p7 = scmp.ne.s32.totalorder %s2094_s17, %s1628_s4  ;;  %p1632_p8 = scmp.lt.u32.totalorder %s1628_s4, %s2094_s17 }
 0x5e0   :  { %p1634_p9 = pnand %p1632_p8, %p1629_p7 }
 0x5e2   :  { %1637 = shalt.err (!%p1634_p9)
}
 0x5e3   :  { %1039 = dma.vmem_to_hbm [thread:$0]  %s1034_s26, 256, %s2094_s17, [#allocation18], %s1687_s23, %s1687_s23, %s1688_s11   ;;  %v854_v12 = vpop.f32.mrb[8].mxu1 }
 0x5e4   :  { %v1114_v11 = vld [vmem:[%s2089_s12] ss:$0 sm:$0xff]  ;;  %s1690_s14 = smov [#allocation19]   ;;  %v1314_v14 = vpop.f32.mrb[9].mxu1 }
 0x5e5   :  { %s1045_s28 = sshll.u32 %s1690_s14, 4  ;;  %v855_v13 = vadd.f32 %v1114_v11, %v854_v12  ;;  %v857_v15 = vpop.f32.mrb[10].mxu1  ;;  %s1046_s28 = int_to_ptr.vmem [resolvable:$true] %s1045_s28 }
 0x5e6   :  { %v858_v16 = vadd.f32 %v1114_v11, %v857_v15  ;;  %v1315_v17 = vpop.f32.mrb[11].mxu1  ;;  %s1638_s27 = scalar_lea.vmem %s1046_s28, 256  ;;  %p1643_p11 = scmp.lt.s32.totalorder %s1046_s28, %s1046_s28 }
 0x5e7   :  { %863 = vst [vmem:[#allocation19] sm:$0xff] %v855_v13  ;;  %p1639_p10 = scmp.ne.s32.totalorder %s1046_s28, %s1638_s27  ;;  %p1644_p12 = scmp.lt.s32.totalorder %s1638_s27, %s1638_s27 }
 0x5e8   :  { %864 = vst [vmem:[#allocation19 + $0x8] sm:$0xff] %v858_v16 }
 0x5e9   :  { %p1645_p13 = por %p1644_p12, %p1643_p11 }
 0x5eb   :  { %p1646_p0 = pnand %p1645_p13, %p1639_p10 }
 0x5ed   :  { %1649 = shalt.err (!%p1646_p0)
}
 0x5ee   :  { %s2106_s0 = sld [smem:[#allocation30_spill]] }
 0x5f4   :  { %s1650_s20 = scalar_lea.hbm %s2106_s0, 256 }
 0x5f5   :  { %p1651_p1 = scmp.ne.s32.totalorder %s2106_s0, %s1650_s20  ;;  %p1654_p2 = scmp.lt.u32.totalorder %s1650_s20, %s2106_s0 }
 0x5f7   :  { %p1656_p3 = pnand %p1654_p2, %p1651_p1 }
 0x5f9   :  { %1659 = shalt.err (!%p1656_p3)
}
 0x5fa   :  { %1051 = dma.vmem_to_hbm [thread:$0]  %s1046_s28, 256, %s2106_s0, [#allocation18], %s1687_s23, %s1687_s23, %s1688_s11  }
 0x5fb   :  { %1670 = dma.done.wait [#allocation4], 256  }
 0x5fc   :  { %1671 = vsyncadd [#allocation4], 4294967040 }
 0x5fd   :  { %1672 = dma.done.wait [#allocation18], 512  }
 0x5fe   :  { %1673 = vsyncadd [#allocation18], 4294966784 }
 0x5ff   :  { %1061 = vsyncpa [#allocation3], 1 }
 0x600   :  { %1062 = vsyncpa [#allocation6], 1 }
 0x601   :  { %1063 = vsyncpa [#allocation9], 1 }
 0x602   :  { %1064 = vsyncpa [#allocation12], 1 }
 0x603   :  { %1065 = vsyncpa [#allocation15], 1 }
 0x604   :  { %1066 = vsyncpa [#allocation4], 1 }
 0x605   :  { %1067 = vsyncpa [#allocation18], 1 }

</bundles_post_ra>
